<compile_context>
chip_gen: v7x
topology: tpu7x:2x2x1
jax: 0.10.0
libtpu: 0.0.40
codegen_flags: <defaults>
</compile_context>

<pallas_src>
import functools

import jax
import jax.numpy as jnp
from jax.experimental import pallas as pl
from jax.experimental.pallas import tpu as pltpu


def _transformer_kernel(coords_ref, img_ref, trs_ref, out_ref, *, H, W, chunk):
    """One (batch, shift_i, shift_j) grid step.

    coords_ref : (2, HWp)          f32   rows: xq, yq of each output pixel
    img_ref    : (1, Z, HWp)       f32
    trs_ref    : (1, 6, HWp)       f32
    out_ref    : (1, 1, 1, Z, HWp) f32   sample at shift (i-1, j-1)
    """
    HWp = img_ref.shape[2]
    ai = (pl.program_id(1) - 1).astype(jnp.float32)   # i - 1
    aj = (pl.program_id(2) - 1).astype(jnp.float32)   # j - 1

    img = img_ref[0]                                   # (Z, HWp)
    # Input-pixel (K-dim) index, shared by every chunk; hoisted (sits in VMEM).
    qin = jax.lax.broadcasted_iota(jnp.int32, (HWp, chunk), 0)

    num_chunks = HWp // chunk

    def chunk_body(c, carry):
        c0 = pl.multiple_of(c * chunk, chunk)
        trs_c = trs_ref[0, :, pl.ds(c0, chunk)]        # (6, chunk)
        xq = coords_ref[0:1, pl.ds(c0, chunk)]         # (1, chunk)
        yq = coords_ref[1:2, pl.ds(c0, chunk)]         # (1, chunk)

        # Unnormalized sample position (align_corners=True folded analytically).
        px = (xq + (0.5 * (W - 1)) * trs_c[2:3]
              + ai * (trs_c[0:1] * ((W - 1) / (H - 1)))
              + aj * trs_c[1:2])
        py = (yq + (0.5 * (H - 1)) * trs_c[5:6]
              + ai * trs_c[3:4]
              + aj * (trs_c[4:5] * ((H - 1) / (W - 1))))

        x0f = jnp.floor(px)
        y0f = jnp.floor(py)
        wx1 = px - x0f
        wx0 = 1.0 - wx1
        wy1 = py - y0f
        wy0 = 1.0 - wy1
        x0 = x0f.astype(jnp.int32)
        y0 = y0f.astype(jnp.int32)

        # zeros padding: pre-mask each corner weight by its validity.  This
        # also keeps flat-index row-wraparound aliases (x0 == W-1 -> base+1
        # lands in the next row) harmless.
        vx0 = (x0 >= 0) & (x0 <= W - 1)
        vx1 = (x0 >= -1) & (x0 <= W - 2)
        vy0 = (y0 >= 0) & (y0 <= H - 1)
        vy1 = (y0 >= -1) & (y0 <= H - 2)
        w00 = jnp.where(vy0 & vx0, wy0 * wx0, 0.0)
        w01 = jnp.where(vy0 & vx1, wy0 * wx1, 0.0)
        w10 = jnp.where(vy1 & vx0, wy1 * wx0, 0.0)
        w11 = jnp.where(vy1 & vx1, wy1 * wx1, 0.0)
        base = y0 * W + x0                              # (1, chunk)

        # Selection matrix: compare qin directly against the four broadcast
        # corner indices (no full-tile subtract), select the masked weight.
        sm = jnp.where(qin == base, w00,
             jnp.where(qin == base + 1, w01,
             jnp.where(qin == base + W, w10,
             jnp.where(qin == base + (W + 1), w11, 0.0))))

        res = jnp.dot(img, sm, preferred_element_type=jnp.float32)
        out_ref[0, 0, 0, :, pl.ds(c0, chunk)] = res.astype(out_ref.dtype)
        return carry

    jax.lax.fori_loop(0, num_chunks, chunk_body, 0, unroll=num_chunks <= 4)


def transformer_layer(img, trs):
    """Pallas implementation of Transformer_Layer.forward.

    img: (N, Z, H, W) float32, trs: (N, 6, H, W) float32
    returns: (N, Z, 3H, 3W) float32
    """
    N, Z, H, W = img.shape
    assert H > 1 and W > 1, "Transformer_Layer requires H > 1 and W > 1"
    HW = H * W
    HWp = ((HW + 127) // 128) * 128                 # lane-dense, 128-aligned
    chunk = 256 if HWp % 256 == 0 else 128          # fill the 256-wide MXU

    img_f = img.reshape(N, Z, HW).astype(jnp.float32)
    trs_f = trs.reshape(N, 6, HW).astype(jnp.float32)
    if HWp != HW:
        pad = HWp - HW
        img_f = jnp.pad(img_f, ((0, 0), (0, 0), (0, pad)))
        trs_f = jnp.pad(trs_f, ((0, 0), (0, 0), (0, pad)))

    # Static output-pixel coordinates (padded columns land out of range ->
    # zero weights in-kernel; their output is sliced off below).
    p = jnp.arange(HWp, dtype=jnp.int32)
    coords = jnp.stack([(p % W).astype(jnp.float32),
                        (p // W).astype(jnp.float32)], axis=0)   # (2, HWp)

    kernel = functools.partial(_transformer_kernel, H=H, W=W, chunk=chunk)

    out = pl.pallas_call(
        kernel,
        out_shape=jax.ShapeDtypeStruct((N, 3, 3, Z, HWp), jnp.float32),
        grid=(N, 3, 3),
        in_specs=[
            pl.BlockSpec((2, HWp), lambda n, i, j: (0, 0)),
            pl.BlockSpec((1, Z, HWp), lambda n, i, j: (n, 0, 0)),
            pl.BlockSpec((1, 6, HWp), lambda n, i, j: (n, 0, 0)),
        ],
        out_specs=pl.BlockSpec((1, 1, 1, Z, HWp),
                               lambda n, i, j: (n, i, j, 0, 0)),
        compiler_params=pltpu.CompilerParams(
            dimension_semantics=("parallel", "parallel", "parallel"),
            vmem_limit_bytes=32 * 1024 * 1024),
    )(coords, img_f, trs_f)

    # Strip padding and re-interleave: result[:, :, i::3, j::3] = sample(i, j)
    out = out[..., :HW].reshape(N, 3, 3, Z, H, W)
    out = out.transpose(0, 3, 4, 1, 5, 2).reshape(N, Z, 3 * H, 3 * W)
    return out


# ---------------- pure-JAX reference (for verification only) ----------------
def _grid_sample_ref(img, gx, gy):
    N, Z, H, W = img.shape
    px = (gx + 1.0) * 0.5 * (W - 1)
    py = (gy + 1.0) * 0.5 * (H - 1)
    x0 = jnp.floor(px)
    y0 = jnp.floor(py)
    x1 = x0 + 1
    y1 = y0 + 1
    wx1 = px - x0
    wx0 = 1.0 - wx1
    wy1 = py - y0
    wy0 = 1.0 - wy1
    flat = img.reshape(N, Z, H * W)

    def g(yc, xc, w):
        valid = (xc >= 0) & (xc <= W - 1) & (yc >= 0) & (yc <= H - 1)
        xi = jnp.clip(xc, 0, W - 1).astype(jnp.int32)
        yi = jnp.clip(yc, 0, H - 1).astype(jnp.int32)
        idx = (yi * W + xi).reshape(N, 1, H * W)
        v = jnp.take_along_axis(flat, idx, axis=2).reshape(N, Z, H, W)
        wv = jnp.where(valid, w, 0.0)[:, None]
        return v * wv

    return (g(y0, x0, wy0 * wx0) + g(y0, x1, wy0 * wx1)
            + g(y1, x0, wy1 * wx0) + g(y1, x1, wy1 * wx1))


def transformer_layer_ref(img, trs):
    N, Z, H, W = img.shape
    sx = jnp.broadcast_to(jnp.linspace(-1.0, 1.0, W).reshape(1, 1, W), (N, H, W))
    sy = jnp.broadcast_to(jnp.linspace(-1.0, 1.0, H).reshape(1, H, 1), (N, H, W))
    out = jnp.zeros((N, Z, H * 3, W * 3), jnp.float32)
    for i in range(3):
        for j in range(3):
            gx = (trs[:, 0] * (2 / (H - 1)) * (i - 1)
                  + trs[:, 1] * (2 / (W - 1)) * (j - 1) + trs[:, 2] + sx)
            gy = (trs[:, 3] * (2 / (H - 1)) * (i - 1)
                  + trs[:, 4] * (2 / (W - 1)) * (j - 1) + trs[:, 5] + sy)
            samp = _grid_sample_ref(img, gx, gy)
            out = out.at[:, :, i::3, j::3].set(samp)
    return out


if __name__ == "__main__":
    key = jax.random.PRNGKey(0)
    k1, k2 = jax.random.split(key)
    N, Z, H, W = 2, 4, 16, 16
    img = jax.random.normal(k1, (N, Z, H, W), dtype=jnp.float32)
    trs = jax.random.normal(k2, (N, 6, H, W), dtype=jnp.float32) * 0.2

    out = transformer_layer(img, trs)
    jax.block_until_ready(out)

    assert out.shape == (N, Z, 3 * H, 3 * W), out.shape
    ref = transformer_layer_ref(img, trs)
    # Default MXU contract precision runs the f32 dot as bf16 passes
    # (~1e-2 abs error on unit-scale data); structural bugs give O(1) errors.
    max_err = float(jnp.max(jnp.abs(out - ref)))
    assert max_err < 5e-2, f"max abs error {max_err}"

    print("KERNEL_OK")
</pallas_src>

<mosaic_0001>
module attributes {stable_mosaic.version = 11 : i64} {
  func.func @_transformer_kernel(%arg0: i32, %arg1: i32, %arg2: i32, %arg3: memref<2x256xf32, #tpu.memory_space<vmem>>, %arg4: memref<1x4x256xf32, #tpu.memory_space<vmem>>, %arg5: memref<1x6x256xf32, #tpu.memory_space<vmem>>, %arg6: memref<1x1x1x4x256xf32, #tpu.memory_space<vmem>>) attributes {dimension_semantics = [#tpu.dimension_semantics<parallel>, #tpu.dimension_semantics<parallel>, #tpu.dimension_semantics<parallel>], iteration_bounds = array<i64: 2, 3, 3>, scalar_prefetch = 0 : i64, scratch_operands = 0 : i64, tpu.core_type = #tpu.core_type<tc>, window_params = [{pipeline_mode = #tpu.pipeline_mode<synchronous>, transform_indices = @transform_0, window_bounds = array<i64: 2, 256>}, {transform_indices = @transform_1, window_bounds = array<i64: 1, 4, 256>}, {transform_indices = @transform_2, window_bounds = array<i64: 1, 6, 256>}, {transform_indices = @transform_3, window_bounds = array<i64: 1, 1, 1, 4, 256>}]} {
    %c1_i32 = arith.constant 1 : i32
    %0 = arith.subi %arg1, %c1_i32 : i32
    %1 = arith.sitofp %0 : i32 to f32
    %c1_i32_0 = arith.constant 1 : i32
    %2 = arith.subi %arg2, %c1_i32_0 : i32
    %3 = arith.sitofp %2 : i32 to f32
    %c0 = arith.constant 0 : index
    %c0_1 = arith.constant 0 : index
    %c0_2 = arith.constant 0 : index
    %4 = vector.load %arg4[%c0, %c0_1, %c0_2] : memref<1x4x256xf32, #tpu.memory_space<vmem>>, vector<1x4x256xf32>
    %5 = vector.shape_cast %4 : vector<1x4x256xf32> to vector<4x256xf32>
    %6 = tpu.iota {dimensions = array<i32: 0>} : vector<256x256xi32>
    %c0_i32 = arith.constant 0 : i32
    %c256_i32 = arith.constant 256 : i32
    %7 = arith.muli %c0_i32, %c256_i32 : i32
    %8 = tpu.assume_multiple %7, 256 : i32
    %c0_3 = arith.constant 0 : index
    %c0_4 = arith.constant 0 : index
    %9 = arith.index_cast %8 : i32 to index
    %10 = vector.load %arg5[%c0_3, %c0_4, %9] : memref<1x6x256xf32, #tpu.memory_space<vmem>>, vector<1x6x256xf32>
    %11 = vector.shape_cast %10 : vector<1x6x256xf32> to vector<6x256xf32>
    %c0_5 = arith.constant 0 : index
    %12 = arith.index_cast %8 : i32 to index
    %13 = vector.load %arg3[%c0_5, %12] : memref<2x256xf32, #tpu.memory_space<vmem>>, vector<1x256xf32>
    %c1 = arith.constant 1 : index
    %14 = arith.index_cast %8 : i32 to index
    %15 = vector.load %arg3[%c1, %14] : memref<2x256xf32, #tpu.memory_space<vmem>>, vector<1x256xf32>
    %16 = vector.extract_strided_slice %11 {offsets = [2, 0], sizes = [1, 256], strides = [1, 1]} : vector<6x256xf32> to vector<1x256xf32>
    %cst = arith.constant 7.500000e+00 : f32
    %17 = vector.broadcast %cst : f32 to vector<1x256xf32>
    %18 = arith.mulf %17, %16 : vector<1x256xf32>
    %19 = arith.addf %13, %18 : vector<1x256xf32>
    %20 = vector.extract_strided_slice %11 {offsets = [0, 0], sizes = [1, 256], strides = [1, 1]} : vector<6x256xf32> to vector<1x256xf32>
    %cst_6 = arith.constant 1.000000e+00 : f32
    %21 = vector.broadcast %cst_6 : f32 to vector<1x256xf32>
    %22 = arith.mulf %20, %21 : vector<1x256xf32>
    %23 = vector.broadcast %1 : f32 to vector<1x256xf32>
    %24 = arith.mulf %23, %22 : vector<1x256xf32>
    %25 = arith.addf %19, %24 : vector<1x256xf32>
    %26 = vector.extract_strided_slice %11 {offsets = [1, 0], sizes = [1, 256], strides = [1, 1]} : vector<6x256xf32> to vector<1x256xf32>
    %27 = vector.broadcast %3 : f32 to vector<1x256xf32>
    %28 = arith.mulf %27, %26 : vector<1x256xf32>
    %29 = arith.addf %25, %28 : vector<1x256xf32>
    %30 = vector.extract_strided_slice %11 {offsets = [5, 0], sizes = [1, 256], strides = [1, 1]} : vector<6x256xf32> to vector<1x256xf32>
    %cst_7 = arith.constant 7.500000e+00 : f32
    %31 = vector.broadcast %cst_7 : f32 to vector<1x256xf32>
    %32 = arith.mulf %31, %30 : vector<1x256xf32>
    %33 = arith.addf %15, %32 : vector<1x256xf32>
    %34 = vector.extract_strided_slice %11 {offsets = [3, 0], sizes = [1, 256], strides = [1, 1]} : vector<6x256xf32> to vector<1x256xf32>
    %35 = vector.broadcast %1 : f32 to vector<1x256xf32>
    %36 = arith.mulf %35, %34 : vector<1x256xf32>
    %37 = arith.addf %33, %36 : vector<1x256xf32>
    %38 = vector.extract_strided_slice %11 {offsets = [4, 0], sizes = [1, 256], strides = [1, 1]} : vector<6x256xf32> to vector<1x256xf32>
    %cst_8 = arith.constant 1.000000e+00 : f32
    %39 = vector.broadcast %cst_8 : f32 to vector<1x256xf32>
    %40 = arith.mulf %38, %39 : vector<1x256xf32>
    %41 = vector.broadcast %3 : f32 to vector<1x256xf32>
    %42 = arith.mulf %41, %40 : vector<1x256xf32>
    %43 = arith.addf %37, %42 : vector<1x256xf32>
    %44 = math.floor %29 : vector<1x256xf32>
    %45 = math.floor %43 : vector<1x256xf32>
    %46 = arith.subf %29, %44 : vector<1x256xf32>
    %cst_9 = arith.constant 1.000000e+00 : f32
    %47 = vector.broadcast %cst_9 : f32 to vector<1x256xf32>
    %48 = arith.subf %47, %46 : vector<1x256xf32>
    %49 = arith.subf %43, %45 : vector<1x256xf32>
    %cst_10 = arith.constant 1.000000e+00 : f32
    %50 = vector.broadcast %cst_10 : f32 to vector<1x256xf32>
    %51 = arith.subf %50, %49 : vector<1x256xf32>
    %52 = arith.fptosi %44 : vector<1x256xf32> to vector<1x256xi32>
    %53 = arith.fptosi %45 : vector<1x256xf32> to vector<1x256xi32>
    %c0_i32_11 = arith.constant 0 : i32
    %54 = vector.broadcast %c0_i32_11 : i32 to vector<1x256xi32>
    %55 = arith.cmpi sge, %52, %54 : vector<1x256xi32>
    %c15_i32 = arith.constant 15 : i32
    %56 = vector.broadcast %c15_i32 : i32 to vector<1x256xi32>
    %57 = arith.cmpi sle, %52, %56 : vector<1x256xi32>
    %58 = arith.andi %55, %57 : vector<1x256xi1>
    %c-1_i32 = arith.constant -1 : i32
    %59 = vector.broadcast %c-1_i32 : i32 to vector<1x256xi32>
    %60 = arith.cmpi sge, %52, %59 : vector<1x256xi32>
    %c14_i32 = arith.constant 14 : i32
    %61 = vector.broadcast %c14_i32 : i32 to vector<1x256xi32>
    %62 = arith.cmpi sle, %52, %61 : vector<1x256xi32>
    %63 = arith.andi %60, %62 : vector<1x256xi1>
    %c0_i32_12 = arith.constant 0 : i32
    %64 = vector.broadcast %c0_i32_12 : i32 to vector<1x256xi32>
    %65 = arith.cmpi sge, %53, %64 : vector<1x256xi32>
    %c15_i32_13 = arith.constant 15 : i32
    %66 = vector.broadcast %c15_i32_13 : i32 to vector<1x256xi32>
    %67 = arith.cmpi sle, %53, %66 : vector<1x256xi32>
    %68 = arith.andi %65, %67 : vector<1x256xi1>
    %c-1_i32_14 = arith.constant -1 : i32
    %69 = vector.broadcast %c-1_i32_14 : i32 to vector<1x256xi32>
    %70 = arith.cmpi sge, %53, %69 : vector<1x256xi32>
    %c14_i32_15 = arith.constant 14 : i32
    %71 = vector.broadcast %c14_i32_15 : i32 to vector<1x256xi32>
    %72 = arith.cmpi sle, %53, %71 : vector<1x256xi32>
    %73 = arith.andi %70, %72 : vector<1x256xi1>
    %74 = arith.andi %68, %58 : vector<1x256xi1>
    %75 = arith.mulf %51, %48 : vector<1x256xf32>
    %cst_16 = arith.constant 0.000000e+00 : f32
    %76 = vector.broadcast %cst_16 : f32 to vector<1x256xf32>
    %77 = arith.select %74, %75, %76 : vector<1x256xi1>, vector<1x256xf32>
    %78 = arith.andi %68, %63 : vector<1x256xi1>
    %79 = arith.mulf %51, %46 : vector<1x256xf32>
    %cst_17 = arith.constant 0.000000e+00 : f32
    %80 = vector.broadcast %cst_17 : f32 to vector<1x256xf32>
    %81 = arith.select %78, %79, %80 : vector<1x256xi1>, vector<1x256xf32>
    %82 = arith.andi %73, %58 : vector<1x256xi1>
    %83 = arith.mulf %49, %48 : vector<1x256xf32>
    %cst_18 = arith.constant 0.000000e+00 : f32
    %84 = vector.broadcast %cst_18 : f32 to vector<1x256xf32>
    %85 = arith.select %82, %83, %84 : vector<1x256xi1>, vector<1x256xf32>
    %86 = arith.andi %73, %63 : vector<1x256xi1>
    %87 = arith.mulf %49, %46 : vector<1x256xf32>
    %cst_19 = arith.constant 0.000000e+00 : f32
    %88 = vector.broadcast %cst_19 : f32 to vector<1x256xf32>
    %89 = arith.select %86, %87, %88 : vector<1x256xi1>, vector<1x256xf32>
    %c16_i32 = arith.constant 16 : i32
    %90 = vector.broadcast %c16_i32 : i32 to vector<1x256xi32>
    %91 = arith.muli %53, %90 : vector<1x256xi32>
    %92 = arith.addi %91, %52 : vector<1x256xi32>
    %93 = vector.broadcast %92 : vector<1x256xi32> to vector<256x256xi32>
    %94 = arith.cmpi eq, %6, %93 : vector<256x256xi32>
    %c1_i32_20 = arith.constant 1 : i32
    %95 = vector.broadcast %c1_i32_20 : i32 to vector<1x256xi32>
    %96 = arith.addi %92, %95 : vector<1x256xi32>
    %97 = vector.broadcast %96 : vector<1x256xi32> to vector<256x256xi32>
    %98 = arith.cmpi eq, %6, %97 : vector<256x256xi32>
    %c16_i32_21 = arith.constant 16 : i32
    %99 = vector.broadcast %c16_i32_21 : i32 to vector<1x256xi32>
    %100 = arith.addi %92, %99 : vector<1x256xi32>
    %101 = vector.broadcast %100 : vector<1x256xi32> to vector<256x256xi32>
    %102 = arith.cmpi eq, %6, %101 : vector<256x256xi32>
    %c17_i32 = arith.constant 17 : i32
    %103 = vector.broadcast %c17_i32 : i32 to vector<1x256xi32>
    %104 = arith.addi %92, %103 : vector<1x256xi32>
    %105 = vector.broadcast %104 : vector<1x256xi32> to vector<256x256xi32>
    %106 = arith.cmpi eq, %6, %105 : vector<256x256xi32>
    %cst_22 = arith.constant 0.000000e+00 : f32
    %107 = vector.shape_cast %89 : vector<1x256xf32> to vector<1x256xf32>
    %108 = vector.broadcast %107 : vector<1x256xf32> to vector<256x256xf32>
    %109 = vector.broadcast %cst_22 : f32 to vector<256x256xf32>
    %110 = arith.select %106, %108, %109 : vector<256x256xi1>, vector<256x256xf32>
    %111 = vector.shape_cast %85 : vector<1x256xf32> to vector<1x256xf32>
    %112 = vector.broadcast %111 : vector<1x256xf32> to vector<256x256xf32>
    %113 = arith.select %102, %112, %110 : vector<256x256xi1>, vector<256x256xf32>
    %114 = vector.shape_cast %81 : vector<1x256xf32> to vector<1x256xf32>
    %115 = vector.broadcast %114 : vector<1x256xf32> to vector<256x256xf32>
    %116 = arith.select %98, %115, %113 : vector<256x256xi1>, vector<256x256xf32>
    %117 = vector.shape_cast %77 : vector<1x256xf32> to vector<1x256xf32>
    %118 = vector.broadcast %117 : vector<1x256xf32> to vector<256x256xf32>
    %119 = arith.select %94, %118, %116 : vector<256x256xi1>, vector<256x256xf32>
    %cst_23 = arith.constant dense<0.000000e+00> : vector<4x256xf32>
    %120 = tpu.matmul %5, %119, %cst_23 {dimension_numbers = #tpu.dot_dimension_numbers<[1], [0], [0], [1], [0, 0, 1, 1], [], []>} : vector<4x256xf32>, vector<256x256xf32>, vector<4x256xf32> -> vector<4x256xf32>
    %c0_24 = arith.constant 0 : index
    %c0_25 = arith.constant 0 : index
    %c0_26 = arith.constant 0 : index
    %c0_27 = arith.constant 0 : index
    %121 = arith.index_cast %8 : i32 to index
    %122 = vector.load %arg6[%c0_24, %c0_25, %c0_26, %c0_27, %121] : memref<1x1x1x4x256xf32, #tpu.memory_space<vmem>>, vector<1x1x1x4x256xf32>
    %123 = vector.shape_cast %122 : vector<1x1x1x4x256xf32> to vector<4x256xf32>
    %124 = vector.shape_cast %120 : vector<4x256xf32> to vector<1x1x1x4x256xf32>
    tpu.vector_store %arg6[%c0_24, %c0_25, %c0_26, %c0_27, %121], %124 {strides = array<i32>} : memref<1x1x1x4x256xf32, #tpu.memory_space<vmem>>, vector<1x1x1x4x256xf32>,
    %c1_i32_28 = arith.constant 1 : i32
    return
  }
  func.func @transform_0(%arg0: i32, %arg1: i32, %arg2: i32) -> (i32, i32) {
    %c0_i32 = arith.constant 0 : i32
    %c0_i32_0 = arith.constant 0 : i32
    %c0_i32_1 = arith.constant 0 : i32
    return %c0_i32, %c0_i32_0 : i32, i32
  }
  func.func @transform_1(%arg0: i32, %arg1: i32, %arg2: i32) -> (i32, i32, i32) {
    %c0_i32 = arith.constant 0 : i32
    %c0_i32_0 = arith.constant 0 : i32
    %c0_i32_1 = arith.constant 0 : i32
    return %arg0, %c0_i32, %c0_i32_0 : i32, i32, i32
  }
  func.func @transform_2(%arg0: i32, %arg1: i32, %arg2: i32) -> (i32, i32, i32) {
    %c0_i32 = arith.constant 0 : i32
    %c0_i32_0 = arith.constant 0 : i32
    %c0_i32_1 = arith.constant 0 : i32
    return %arg0, %c0_i32, %c0_i32_0 : i32, i32, i32
  }
  func.func @transform_3(%arg0: i32, %arg1: i32, %arg2: i32) -> (i32, i32, i32, i32, i32) {
    %c0_i32 = arith.constant 0 : i32
    %c0_i32_0 = arith.constant 0 : i32
    %c0_i32_1 = arith.constant 0 : i32
    return %arg0, %arg1, %arg2, %c0_i32, %c0_i32_0 : i32, i32, i32, i32, i32
  }
}

</mosaic_0001>

<bundles_post_ra>
// kernel: tpu_custom_call.1
= control target key start
LH: loop header
LB: loop body
LE: loop exit
PB: predicated region body
PF: predicated region fallthrough
CT: control target
= control target key end

     0   :  { %s2976_s0 = inlined_call_operand.vmem [shape: f32[2,256], index: 0, kind: input, shape index: {}]   ;;  %s2977_s1 = inlined_call_operand.vmem [shape: f32[2,4,256], index: 1, kind: input, shape index: {}]   ;;  %s2978_s2 = inlined_call_operand.vmem [shape: f32[2,6,256], index: 2, kind: input, shape index: {}]   ;;  %s2979_s3 = inlined_call_operand.hbm [shape: f32[2,3,3,4,256], index: 3, kind: output, shape index: {}]  }
   0x1   :  { %2980 = sst [smem:[#allocation5_spill]] %s2976_s0 }
   0x2   :  { %2981 = sst [smem:[#allocation6_spill]] %s2977_s1 }
   0x3   :  { %8 = vsyncpa [#allocation3], 0 }
   0x4   :  { %10 = vsyncpa [#allocation3 + $0x1], 0  ;;  %s1497_s12 = smov 0   ;;  %s1499_s13 = smov 0  }
   0x5   :  { %s1501_s14 = smov 0   ;;  %s1503_s15 = smov 0  }
   0x6   :  { %s1505_s16 = smov 0   ;;  %s1507_s17 = smov 0  }
   0x7   :  { %s1509_s18 = smov 0   ;;  %s1511_s19 = smov 0  }
   0x8   :  { %s1513_s20 = smov 0   ;;  %s1515_s21 = smov 0  }
   0x9 LB: > { %s1184_s22 = sadd.s32 4294967295, %s1473_s21   ;;  %s28_s23 = sadd.s32 1, %s1461_s18  ;;  %s1473_s21 = sphi %s1515_s21, %s16_s21   ;;  %s1469_s20 = sphi %s1513_s20, %s3002_s20   ;;  %s1465_s19 = sphi %s1511_s19, %s3001_s19   ;;  %s1461_s18 = sphi %s1509_s18, %s3000_s18   ;;  %s1457_s17 = sphi %s1507_s17, %s2999_s17   ;;  %s1453_s16 = sphi %s1505_s16, %s2998_s16   ;;  %s1449_s15 = sphi %s1503_s15, %s2997_s15   ;;  %s1445_s14 = sphi %s1501_s14, %s2996_s14   ;;  %s1441_s13 = sphi %s1499_s13, %s2995_s13   ;;  %s1437_s12 = sphi %s1497_s12, %s2994_s12  }
   0xa   : > { %p29_p0 = scmp.ge.s32.totalorder %s28_s23, 3  ;;  %s31_s24 = sadd.s32 1, %s1465_s19 }
   0xb   : > { %s1185_s25 = sadd.s32 4294967294, %s1473_s21   ;;  %p129_p1 = scmp.ne.s32.totalorder %s1445_s14, %s1441_s13 }
   0xc   : > { %s3004_s23 = smov (%p29_p0, %s28_s23), 0  ;;  %s3006_s24 = smov (!%p29_p0, %s31_s24), %s1465_s19 }
   0xd   : > { %s35_s26 = sadd.s32 1, %s1469_s20  ;;  %p130_p2 = scmp.eq.s32.totalorder %s1184_s22, 17 }
   0xe   : > { %p33_p3 = scmp.ge.s32.totalorder %s3006_s24, 3  ;;  %p135_p4 = scmp.ne.s32.totalorder %s1441_s13, %s1437_s12 }
   0xf   : > { %p1559_p5 = por %p130_p2, %p129_p1  ;;  %p136_p6 = scmp.eq.s32.totalorder %s1185_s25, 17 }
  0x10   : > { %s3008_s24 = smov (%p33_p3, %s3006_s24), 0  ;;  %s3010_s26 = smov (!%p33_p3, %s35_s26), %s1469_s20 }
  0x11   : > { %p1566_p7 = por %p136_p6, %p135_p4  ;;  %p37_p8 = scmp.ge.s32.totalorder %s3010_s26, 2 }
  0x12   : > { %p1188_p9 = scmp.ge.s32.totalorder %s1473_s21, 1  ;;  %s113_s29 = ssub.s32 %s1465_s19, %s3008_s24 }
  0x13   : > { %p173_p10 = scmp.lt.s32.totalorder %s1473_s21, 19  ;;  %s3012_s26 = smov (%p37_p8, %s3010_s26), 0 }
  0x14   : > { %s115_s30 = ssub.s32 %s1461_s18, %s3004_s23  ;;  %s112_s4 = ssub.s32 %s1469_s20, %s3012_s26 }
  0x15   : > { %p174_p11 = pnand %p1188_p9, %p173_p10  ;;  %s114_s5 = sor.u32 %s113_s29, %s112_s4 }
  0x16   : > { %s116_s6 = sor.u32 %s115_s30, %s114_s5  ;;  %s119_s7 = sadd.s32 1, %s1445_s14  ;;  %v217_v0 = vlaneseq (!%p174_p11)  ;;  %v1475_v2 = vmov (!%p174_p11), 1966171168  }
  0x17   : > { %p117_p12 = scmp.eq.s32.totalorder %s116_s6, 0  ;;  %177 = sbr.rel (%p174_p11) target bundleno = 441 (0x1b9), region = 32  ;;  %v261_v3 = vunpack.c.l.s4 (!%p174_p11), %v1475_v2 }
  0x18   : > { %p202_p13 = scmp.lt.s32.totalorder (!%p174_p11), %s1457_s17, 1  ;;  %s1194_s9 = sadd.s32 (!%p174_p11), 4294967295, %s1453_s16  ;;  %v1590_v1 = vshrl.u32 (!%p174_p11), %v217_v0, 7 }
  0x19   : > { %s1582_s8 = scalar_select %p117_p12, %s1445_s14, %s119_s7  }
  0x1a   : > { %s213_s10 = scvt.s32.f32 (!%p174_p11), %s1194_s9  ;;  %s1195_s11 = sadd.s32 (!%p174_p11), 4294967295, %s1449_s15  ;;  %v262_v4 = vunpack.c.0.s8 (!%p174_p11), %v261_v3  ;;  %v1604_v43 = vadd.s32 (!%p174_p11), 8, %v1590_v1  ;;  %v1607_v46 = vsub.s32 (!%p174_p11), 0, %v1590_v1  ;;  %v1610_v47 = vsub.s32 (!%p174_p11), 1, %v1590_v1 }
  0x1b   : > { %s215_s25 = scvt.s32.f32 (!%p174_p11), %s1195_s11  ;;  %s2984_s0 = sld [smem:[#allocation5_spill]] (!%p174_p11)  ;;  %v1613_v48 = vadd.s32 (!%p174_p11), 16, %v1590_v1  ;;  %v1616_v49 = vadd.s32 (!%p174_p11), 24, %v1590_v1  ;;  %v1619_v50 = vadd.s32 (!%p174_p11), 32, %v1590_v1  ;;  %v1622_v51 = vadd.s32 (!%p174_p11), 40, %v1590_v1 }
  0x1c   : > { %v277_v5 = vstv (!%p174_p11), %s213_s10  ;;  %v265_v9 = vsub.s32 (!%p174_p11), %v262_v4, %v1590_v1  ;;  %v1625_v54 = vadd.s32 (!%p174_p11), 48, %v1590_v1  ;;  %v1628_v55 = vadd.s32 (!%p174_p11), 56, %v1590_v1  ;;  %s2993_s1 = sld [smem:[#allocation6_spill]] (!%p174_p11)  ;;  %s1272_s30 = smul.u32 (!%p174_p11), 6, %s1453_s16 }
  0x1d   : > { %v299_v6 = vstv (!%p174_p11), %s215_s25  ;;  %v1631_v56 = vadd.s32 (!%p174_p11), 64, %v1590_v1  ;;  %v1634_v57 = vadd.s32 (!%p174_p11), 72, %v1590_v1  ;;  %v1637_v58 = vadd.s32 (!%p174_p11), 80, %v1590_v1  ;;  %s199_s4 = sand.u32 (!%p174_p11), 1, %s1441_s13   ;;  %s1273_s6 = smul.u32 (!%p174_p11), 18, %s1457_s17 }
  0x1e   : > { %s1588_s22 = scalar_select %p202_p13, %s1457_s17, 1  ;;  %v1640_v59 = vadd.s32 88, %v1590_v1  ;;  %v1643_v0 = vadd.s32 96, %v1590_v1  ;;  %v1646_v2 = vadd.s32 104, %v1590_v1  ;;  %v1649_v3 = vadd.s32 112, %v1590_v1 }
  0x1f   : > { %v1652_v4 = vadd.s32 120, %v1590_v1  ;;  %s1189_s7 = sshll.u32 %s199_s4, 3  ;;  %s1476_s17 = smov [#allocation2]  }
  0x20   : > { %s1203_s29 = sshll.u32 %s1588_s22, 4  ;;  %s1202_s11 = sshll.u32 %s1588_s22, 3 }
  0x21   : > { %s211_s5 = scalar_lea.vmem %s2978_s2, %s1203_s29  ;;  %v252_v29 = vld [vmem:[%s2984_s0] ss:$2 sm:$0x3]  ;;  %v1196_v30 = vld [vmem:[%s2984_s0 + $0x1] ss:$2 sm:$0x3] }
  0x22   : > { %v250_v7 = vld [vmem:[%s211_s5] sm:$0x3f]  ;;  %v251_v8 = vld [vmem:[%s211_s5 + $0x8] sm:$0x3f]  ;;  %s206_s29 = scalar_lea.vmem %s2993_s1, %s1202_s11  ;;  %s1198_s5 = sshll.u32 %s1449_s15, 1 }
  0x23   : > { %v255_v10 = vmul.f32 7.5, %v250_v7  ;;  %v256_v11 = vmul.f32 7.5, %v251_v8  ;;  %v278_v12 = vmul.f32 %v277_v5, %v250_v7  ;;  %v279_v13 = vmul.f32 %v277_v5, %v251_v8  ;;  %s1085_s9 = sadd.s32 %s1272_s30, %s1198_s5  ;;  %s201_s22 = scalar_lea.vmem [#allocation2], %s1189_s7 }
  0x24   : > { %v300_v14 = vmul.f32 %v299_v6, %v250_v7  ;;  %v301_v15 = vmul.f32 %v299_v6, %v251_v8  ;;  %v1655_v8 = vadd.s32 128, %v1590_v1  ;;  %s1087_s10 = sadd.s32 %s1273_s6, %s1085_s9  ;;  %s1091_s25 = sshll.u32 %s201_s22, 4  ;;  %s2919_s25 = int_to_ptr.vmem [resolvable:$true] %s1091_s25 }
  0x25   : > { %v259_v16 = vcombine.low %v255_v10, %v256_v11  ;;  %v282_v17 = vcombine.low %v278_v12, %v279_v13  ;;  %v322_v18 = vcombine.high %v255_v10, %v256_v11  ;;  %v1658_v10 = vadd.s32 136, %v1590_v1  ;;  %s1199_s11 = sshll.u32 %s1087_s10, 6  ;;  %s1073_s15 = scalar_lea.sflag [#allocation3], %s199_s4 }
  0x26   : > { %v304_v19 = vcombine.low %v300_v14, %v301_v15  ;;  %v351_v20 = vcombine.high %v300_v14, %v301_v15  ;;  %v1661_v11 = vadd.s32 144, %v1590_v1  ;;  %v1664_v12 = vadd.s32 152, %v1590_v1  ;;  %s2917_s1 = scalar_lea.hbm %s2979_s3, %s1199_s11  ;;  %s1363_s16 = scalar_lea.vmem %s2919_s25, 128 }
  0x27   : > { %v266_v21 = vrot.slane %v259_v16, %v265_v9  ;;  %v289_v22 = vrot.slane %v282_v17, %v265_v9  ;;  %v329_v23 = vrot.slane %v322_v18, %v265_v9  ;;  %v1675_v17 = vadd.s32 160, %v1590_v1  ;;  %p1364_p0 = scmp.ne.s32.totalorder %s2919_s25, %s1363_s16  ;;  %s1367_s30 = sshll.u32 %s1476_s17, 4  ;;  %s1368_s30 = int_to_ptr.vmem [resolvable:$false] %s1367_s30 }
  0x28   : > { %v311_v24 = vrot.slane %v304_v19, %v265_v9  ;;  %v358_v25 = vrot.slane %v351_v20, %v265_v9  ;;  %v1678_v18 = vadd.s32 168, %v1590_v1  ;;  %s1369_s5 = scalar_lea.vmem %s1368_s30, 256  ;;  %p1370_p3 = scmp.lt.s32.totalorder %s2919_s25, %s1368_s30 }
  0x29   : > { %v273_v26 = vrot.slane %v266_v21, %v265_v9  ;;  %v330_v27 = vcombine.high %v329_v23, %v329_v23  ;;  %v340_v28 = vcombine.high %v289_v22, %v289_v22  ;;  %v296_v33 = vrot.slane %v289_v22, %v265_v9  ;;  %p1365_p1 = pnand %p1364_p0, %p1559_p5  ;;  %p1371_p4 = scmp.lt.s32.totalorder %s1369_s5, %s1363_s16 }
  0x2a   : > { %v312_v31 = vcombine.high %v311_v24, %v311_v24  ;;  %v365_v36 = vrot.slane %v358_v25, %v265_v9  ;;  %v1685_v21 = vadd.s32 176, %v1590_v1  ;;  %v1688_v22 = vadd.s32 184, %v1590_v1 }
  0x2b   : > { %v274_v32 = vcombine.high %v273_v26, %v273_v26  ;;  %v337_v34 = vrot.slane %v330_v27, %v265_v9  ;;  %v347_v35 = vrot.slane %v340_v28, %v265_v9  ;;  %v1691_v23 = vadd.s32 192, %v1590_v1  ;;  %p1366_p2 = pneg %p1365_p1  ;;  %p1372_p6 = por %p1371_p4, %p1370_p3 }
  0x2c   : > { %v319_v38 = vrot.slane %v312_v31, %v265_v9  ;;  %v1698_v27 = vadd.s32 200, %v1590_v1  ;;  %v1701_v28 = vadd.s32 208, %v1590_v1  ;;  %v1711_v31 = vadd.s32 224, %v1590_v1 }
  0x2d   : > { %v276_v37 = vadd.f32 %v274_v32, %v252_v29  ;;  %v339_v39 = vadd.f32 %v1196_v30, %v337_v34  ;;  %v348_v40 = vcombine.high %v347_v35, %v347_v35  ;;  %v1708_v30 = vadd.s32 216, %v1590_v1  ;;  %p1373_p8 = pnand %p1372_p6, %p1366_p2 }
  0x2e   : > { %v1714_v32 = vadd.s32 232, %v1590_v1 }
  0x2f   : > { %v298_v41 = vadd.f32 %v296_v33, %v276_v37  ;;  %v350_v42 = vadd.f32 %v348_v40, %v339_v39 }
  0x31   : > { %v321_v44 = vadd.f32 %v319_v38, %v298_v41  ;;  %v367_v45 = vadd.f32 %v365_v36, %v350_v42 }
  0x33   : > { %v368_v52 = vfloor.f32 %v321_v44  ;;  %v369_v53 = vfloor.f32 %v367_v45 }
  0x35   : > { %v370_v60 = vsub.f32 %v321_v44, %v368_v52  ;;  %v372_v61 = vsub.f32 %v367_v45, %v369_v53  ;;  %v1268_v62 = vtrunc.f32 %v368_v52  ;;  %v1270_v63 = vtrunc.f32 %v369_v53 }
  0x37   : > { %v373_v5 = vsub.f32 1.0, %v372_v61  ;;  %v1269_v6 = vcvt.f32.s32 %v1268_v62  ;;  %v1271_v7 = vcvt.f32.s32 %v1270_v63  ;;  %v371_v9 = vsub.f32 1.0, %v370_v60 }
  0x38   : > { %v398_v29 = vmul.f32 %v372_v61, %v370_v60 }
  0x39   : > { %vm376_vm0 = vcmp.ge.s32.totalorder %v1269_v6, 0  ;;  %vm377_vm1 = vcmp.le.s32.totalorder %v1269_v6, 15  ;;  %vm379_vm2 = vcmp.ge.s32.totalorder %v1269_v6, 4294967295  ;;  %vm380_vm3 = vcmp.le.s32.totalorder %v1269_v6, 14 }
  0x3a   : > { %vm1666_vm4 = vmand %vm376_vm0, %vm377_vm1  ;;  %vm382_vm5 = vcmp.ge.s32.totalorder %v1271_v7, 0  ;;  %vm383_vm6 = vcmp.le.s32.totalorder %v1271_v7, 15  ;;  %vm385_vm7 = vcmp.ge.s32.totalorder %v1271_v7, 4294967295  ;;  %vm386_vm8 = vcmp.le.s32.totalorder %v1271_v7, 14 }
  0x3b   : > { %vm1670_vm9 = vmand %vm379_vm2, %vm380_vm3  ;;  %v389_v15 = vmul.f32 %v373_v5, %v371_v9  ;;  %v400_v16 = vmul.u32 16, %v1271_v7  ;;  %v392_v20 = vmul.f32 %v373_v5, %v370_v60  ;;  %v395_v25 = vmul.f32 %v372_v61, %v371_v9 }
  0x3c   : > { %vm1680_vm10 = vmand %vm382_vm5, %vm383_vm6 }
  0x3d   : > { %vm1693_vm11 = vmand %vm385_vm7, %vm386_vm8  ;;  %v401_v26 = vadd.s32 %v1269_v6, %v400_v16 }
  0x3e   : > { %vm388_vm12 = vmand %vm1680_vm10, %vm1666_vm4 }
  0x3f   : > { %v390_v33 = vsel %vm388_vm12, %v389_v15, 0.0  ;;  %vm391_vm13 = vmand %vm1680_vm10, %vm1670_vm9  ;;  %v1721_v34 = vrot.slane %v401_v26, %v1610_v47  ;;  %v474_v35 = vadd.s32 1, %v401_v26  ;;  %v547_v36 = vadd.s32 16, %v401_v26 }
  0x40   : > { %v393_v37 = vsel %vm391_vm13, %v392_v20, 0.0  ;;  %vm394_vm14 = vmand %vm1693_vm11, %vm1666_vm4  ;;  %v620_v38 = vadd.s32 17, %v401_v26  ;;  %v1728_v39 = vrot.slane %v390_v33, %v1610_v47  ;;  %v1731_v40 = vrot.slane %v401_v26, %v1607_v46 }
  0x41   : > { %v396_v41 = vsel %vm394_vm14, %v395_v25, 0.0  ;;  %vm397_vm15 = vmand %vm1693_vm11, %vm1670_vm9  ;;  %vm411_vm0 = vcmp.eq.s32.totalorder %v1590_v1, %v1721_v34  ;;  %vm413_vm1 = vcmp.eq.s32.totalorder %v1604_v43, %v1721_v34  ;;  %v1742_v42 = vrot.slane %v474_v35, %v1610_v47 }
  0x42   : > { %v399_v44 = vsel %vm397_vm15, %v398_v29, 0.0  ;;  %v1745_v45 = vrot.slane %v547_v36, %v1610_v47  ;;  %v1748_v52 = vrot.slane %v620_v38, %v1610_v47  ;;  %v1751_v53 = vrot.slane %v396_v41, %v1610_v47 }
  0x43   : > { %vm484_vm2 = vcmp.eq.s32.totalorder %v1590_v1, %v1742_v42  ;;  %vm486_vm3 = vcmp.eq.s32.totalorder %v1604_v43, %v1742_v42  ;;  %v1758_v60 = vrot.slane %v399_v44, %v1607_v46  ;;  %v1761_v61 = vrot.slane %v399_v44, %v1610_v47 }
  0x44   : > { %vm557_vm4 = vcmp.eq.s32.totalorder %v1590_v1, %v1745_v45  ;;  %vm559_vm5 = vcmp.eq.s32.totalorder %v1604_v43, %v1745_v45  ;;  %vm630_vm6 = vcmp.eq.s32.totalorder %v1590_v1, %v1748_v52  ;;  %vm632_vm7 = vcmp.eq.s32.totalorder %v1604_v43, %v1748_v52 }
  0x45   : > { %v705_v62 = vsel %vm630_vm6, %v1761_v61, 0.0  ;;  %v707_v63 = vsel %vm632_vm7, %v1761_v61, 0.0  ;;  %v1774_v5 = vrot.slane %v393_v37, %v1610_v47  ;;  %vm410_vm8 = vcmp.eq.s32.totalorder %v1590_v1, %v1731_v40 }
  0x46   : > { %v780_v6 = vsel %vm557_vm4, %v1751_v53, %v705_v62  ;;  %v782_v7 = vsel %vm559_vm5, %v1751_v53, %v707_v63  ;;  %vm412_vm9 = vcmp.eq.s32.totalorder %v1604_v43, %v1731_v40  ;;  %v1783_v9 = vrot.slane %v474_v35, %v1607_v46 }
  0x47   : > { %v855_v13 = vsel %vm484_vm2, %v1774_v5, %v780_v6  ;;  %v857_v47 = vsel %vm486_vm3, %v1774_v5, %v782_v7  ;;  %v1794_v14 = vrot.slane %v547_v36, %v1607_v46  ;;  %v1797_v15 = vrot.slane %v620_v38, %v1607_v46 }
  0x48   : > { %v930_v16 = vsel %vm411_vm0, %v1728_v39, %v855_v13  ;;  %v932_v19 = vsel %vm413_vm1, %v1728_v39, %v857_v47  ;;  %vm483_vm10 = vcmp.eq.s32.totalorder %v1590_v1, %v1783_v9  ;;  %vm485_vm11 = vcmp.eq.s32.totalorder %v1604_v43, %v1783_v9 }
  0x49   : > { %v1204_v20 = vpack.c.bf16 %v932_v19, %v930_v16  ;;  %vm556_vm12 = vcmp.eq.s32.totalorder %v1590_v1, %v1794_v14  ;;  %vm558_vm13 = vcmp.eq.s32.totalorder %v1604_v43, %v1794_v14  ;;  %vm629_vm14 = vcmp.eq.s32.totalorder %v1590_v1, %v1797_v15 }
  0x4a   : > { %vm631_vm15 = vcmp.eq.s32.totalorder %v1604_v43, %v1797_v15  ;;  %v704_v24 = vsel %vm629_vm14, %v1758_v60, 0.0  ;;  %v1821_v25 = vrot.slane %v396_v41, %v1607_v46  ;;  %v1824_v26 = vrot.slane %v393_v37, %v1607_v46 }
  0x4b   : > { %1205 = vmatprep.subr.bf16.mxu0 %v1204_v20  ;;  %v706_v29 = vsel %vm631_vm15, %v1758_v60, 0.0  ;;  %v1828_v35 = vrot.slane %v390_v33, %v1607_v46  ;;  %vm415_vm0 = vcmp.eq.s32.totalorder %v1613_v48, %v1721_v34  ;;  %vm417_vm1 = vcmp.eq.s32.totalorder %v1616_v49, %v1721_v34 }
  0x4c   : > { %v779_v36 = vsel %vm556_vm12, %v1821_v25, %v704_v24  ;;  %v781_v38 = vsel %vm558_vm13, %v1821_v25, %v706_v29  ;;  %vm488_vm2 = vcmp.eq.s32.totalorder %v1613_v48, %v1742_v42  ;;  %vm490_vm3 = vcmp.eq.s32.totalorder %v1616_v49, %v1742_v42 }
  0x4d   : > { %v854_v46 = vsel %vm483_vm10, %v1824_v26, %v779_v36  ;;  %v856_v33 = vsel %vm485_vm11, %v1824_v26, %v781_v38  ;;  %vm561_vm4 = vcmp.eq.s32.totalorder %v1613_v48, %v1745_v45  ;;  %vm563_vm5 = vcmp.eq.s32.totalorder %v1616_v49, %v1745_v45 }
  0x4e   : > { %v929_v37 = vsel %vm410_vm8, %v1828_v35, %v854_v46  ;;  %v931_v41 = vsel %vm412_vm9, %v1828_v35, %v856_v33  ;;  %vm634_vm6 = vcmp.eq.s32.totalorder %v1613_v48, %v1748_v52  ;;  %vm636_vm7 = vcmp.eq.s32.totalorder %v1616_v49, %v1748_v52 }
  0x4f   : > { %v1206_v44 = vpack.c.bf16 %v931_v41, %v929_v37  ;;  %v709_v62 = vsel %vm634_vm6, %v1761_v61, 0.0  ;;  %v711_v63 = vsel %vm636_vm7, %v1761_v61, 0.0  ;;  %vm414_vm10 = vcmp.eq.s32.totalorder %v1613_v48, %v1731_v40 }
  0x50   : > { %v784_v6 = vsel %vm561_vm4, %v1751_v53, %v709_v62  ;;  %v786_v7 = vsel %vm563_vm5, %v1751_v53, %v711_v63  ;;  %vm416_vm8 = vcmp.eq.s32.totalorder %v1616_v49, %v1731_v40  ;;  %vm487_vm9 = vcmp.eq.s32.totalorder %v1613_v48, %v1783_v9 }
  0x51   : > { %1207 = vmatpush1.bf16.msra.mxu0 %v1206_v44  ;;  %v859_v43 = vsel %vm488_vm2, %v1774_v5, %v784_v6  ;;  %v861_v13 = vsel %vm490_vm3, %v1774_v5, %v786_v7  ;;  %vm489_vm11 = vcmp.eq.s32.totalorder %v1616_v49, %v1783_v9  ;;  %vm560_vm12 = vcmp.eq.s32.totalorder %v1613_v48, %v1794_v14 }
  0x52   : > { %v934_v47 = vsel %vm415_vm0, %v1728_v39, %v859_v43  ;;  %v936_v16 = vsel %vm417_vm1, %v1728_v39, %v861_v13  ;;  %vm562_vm13 = vcmp.eq.s32.totalorder %v1616_v49, %v1794_v14  ;;  %vm633_vm14 = vcmp.eq.s32.totalorder %v1613_v48, %v1797_v15 }
  0x53   : > { %v1208_v19 = vpack.c.bf16 %v936_v16, %v934_v47  ;;  %vm635_vm15 = vcmp.eq.s32.totalorder %v1616_v49, %v1797_v15  ;;  %v708_v20 = vsel %vm633_vm14, %v1758_v60, 0.0  ;;  %vm419_vm0 = vcmp.eq.s32.totalorder %v1619_v50, %v1721_v34 }
  0x54   : > { %v710_v24 = vsel %vm635_vm15, %v1758_v60, 0.0  ;;  %v783_v29 = vsel %vm560_vm12, %v1821_v25, %v708_v20  ;;  %vm421_vm1 = vcmp.eq.s32.totalorder %v1622_v51, %v1721_v34  ;;  %vm492_vm2 = vcmp.eq.s32.totalorder %v1619_v50, %v1742_v42 }
  0x55   : > { %1209 = vmatprep.subr.bf16.mxu0 %v1208_v19  ;;  %v785_v36 = vsel %vm562_vm13, %v1821_v25, %v710_v24  ;;  %v858_v38 = vsel %vm487_vm9, %v1824_v26, %v783_v29  ;;  %vm494_vm3 = vcmp.eq.s32.totalorder %v1622_v51, %v1742_v42  ;;  %vm565_vm4 = vcmp.eq.s32.totalorder %v1619_v50, %v1745_v45 }
  0x56   : > { %v860_v46 = vsel %vm489_vm11, %v1824_v26, %v785_v36  ;;  %v933_v33 = vsel %vm414_vm10, %v1828_v35, %v858_v38  ;;  %vm567_vm5 = vcmp.eq.s32.totalorder %v1622_v51, %v1745_v45  ;;  %vm638_vm6 = vcmp.eq.s32.totalorder %v1619_v50, %v1748_v52 }
  0x57   : > { %v935_v37 = vsel %vm416_vm8, %v1828_v35, %v860_v46  ;;  %vm640_vm7 = vcmp.eq.s32.totalorder %v1622_v51, %v1748_v52  ;;  %v713_v41 = vsel %vm638_vm6, %v1761_v61, 0.0  ;;  %vm418_vm9 = vcmp.eq.s32.totalorder %v1619_v50, %v1731_v40 }
  0x58   : > { %v1210_v48 = vpack.c.bf16 %v935_v37, %v933_v33  ;;  %v715_v44 = vsel %vm640_vm7, %v1761_v61, 0.0  ;;  %v788_v62 = vsel %vm565_vm4, %v1751_v53, %v713_v41  ;;  %vm420_vm10 = vcmp.eq.s32.totalorder %v1622_v51, %v1731_v40 }
  0x59   : > { %v790_v63 = vsel %vm567_vm5, %v1751_v53, %v715_v44  ;;  %v863_v49 = vsel %vm492_vm2, %v1774_v5, %v788_v62  ;;  %vm491_vm8 = vcmp.eq.s32.totalorder %v1619_v50, %v1783_v9  ;;  %vm493_vm11 = vcmp.eq.s32.totalorder %v1622_v51, %v1783_v9 }
  0x5a   : > { %1211 = vmatpush1.bf16.msra.mxu0 %v1210_v48  ;;  %v865_v6 = vsel %vm494_vm3, %v1774_v5, %v790_v63  ;;  %v938_v7 = vsel %vm419_vm0, %v1728_v39, %v863_v49  ;;  %vm564_vm12 = vcmp.eq.s32.totalorder %v1619_v50, %v1794_v14  ;;  %vm566_vm13 = vcmp.eq.s32.totalorder %v1622_v51, %v1794_v14 }
  0x5b   : > { %v940_v43 = vsel %vm421_vm1, %v1728_v39, %v865_v6  ;;  %vm637_vm14 = vcmp.eq.s32.totalorder %v1619_v50, %v1797_v15  ;;  %vm639_vm15 = vcmp.eq.s32.totalorder %v1622_v51, %v1797_v15  ;;  %vm423_vm0 = vcmp.eq.s32.totalorder %v1625_v54, %v1721_v34 }
  0x5c   : > { %v1212_v13 = vpack.c.bf16 %v940_v43, %v938_v7  ;;  %v712_v47 = vsel %vm637_vm14, %v1758_v60, 0.0  ;;  %v714_v16 = vsel %vm639_vm15, %v1758_v60, 0.0  ;;  %vm425_vm2 = vcmp.eq.s32.totalorder %v1628_v55, %v1721_v34 }
  0x5d   : > { %v787_v19 = vsel %vm564_vm12, %v1821_v25, %v712_v47  ;;  %v789_v20 = vsel %vm566_vm13, %v1821_v25, %v714_v16  ;;  %vm496_vm1 = vcmp.eq.s32.totalorder %v1625_v54, %v1742_v42  ;;  %vm498_vm3 = vcmp.eq.s32.totalorder %v1628_v55, %v1742_v42 }
  0x5e   : > { %1213 = vmatprep.subr.bf16.mxu0 %v1212_v13  ;;  %v862_v24 = vsel %vm491_vm8, %v1824_v26, %v787_v19  ;;  %v864_v29 = vsel %vm493_vm11, %v1824_v26, %v789_v20  ;;  %vm569_vm4 = vcmp.eq.s32.totalorder %v1625_v54, %v1745_v45  ;;  %vm571_vm5 = vcmp.eq.s32.totalorder %v1628_v55, %v1745_v45 }
  0x5f   : > { %v937_v36 = vsel %vm418_vm9, %v1828_v35, %v862_v24  ;;  %v939_v38 = vsel %vm420_vm10, %v1828_v35, %v864_v29  ;;  %vm642_vm6 = vcmp.eq.s32.totalorder %v1625_v54, %v1748_v52  ;;  %vm644_vm7 = vcmp.eq.s32.totalorder %v1628_v55, %v1748_v52 }
  0x60   : > { %v1214_v46 = vpack.c.bf16 %v939_v38, %v937_v36  ;;  %v717_v33 = vsel %vm642_vm6, %v1761_v61, 0.0  ;;  %v719_v37 = vsel %vm644_vm7, %v1761_v61, 0.0  ;;  %vm422_vm8 = vcmp.eq.s32.totalorder %v1625_v54, %v1731_v40 }
  0x61   : > { %v792_v50 = vsel %vm569_vm4, %v1751_v53, %v717_v33  ;;  %v794_v41 = vsel %vm571_vm5, %v1751_v53, %v719_v37  ;;  %vm424_vm9 = vcmp.eq.s32.totalorder %v1628_v55, %v1731_v40  ;;  %vm495_vm10 = vcmp.eq.s32.totalorder %v1625_v54, %v1783_v9 }
  0x62   : > { %1215 = vmatpush1.bf16.msra.mxu0 %v1214_v46  ;;  %v867_v51 = vsel %vm496_vm1, %v1774_v5, %v792_v50  ;;  %v869_v48 = vsel %vm498_vm3, %v1774_v5, %v794_v41  ;;  %vm497_vm11 = vcmp.eq.s32.totalorder %v1628_v55, %v1783_v9  ;;  %vm568_vm12 = vcmp.eq.s32.totalorder %v1625_v54, %v1794_v14 }
  0x63   : > { %v942_v44 = vsel %vm423_vm0, %v1728_v39, %v867_v51  ;;  %v944_v62 = vsel %vm425_vm2, %v1728_v39, %v869_v48  ;;  %vm570_vm13 = vcmp.eq.s32.totalorder %v1628_v55, %v1794_v14  ;;  %vm641_vm14 = vcmp.eq.s32.totalorder %v1625_v54, %v1797_v15 }
  0x64   : > { %v1216_v63 = vpack.c.bf16 %v944_v62, %v942_v44  ;;  %vm643_vm15 = vcmp.eq.s32.totalorder %v1628_v55, %v1797_v15  ;;  %v716_v49 = vsel %vm641_vm14, %v1758_v60, 0.0  ;;  %vm427_vm0 = vcmp.eq.s32.totalorder %v1631_v56, %v1721_v34 }
  0x65   : > { %v718_v6 = vsel %vm643_vm15, %v1758_v60, 0.0  ;;  %v791_v7 = vsel %vm568_vm12, %v1821_v25, %v716_v49  ;;  %vm429_vm2 = vcmp.eq.s32.totalorder %v1634_v57, %v1721_v34  ;;  %vm500_vm1 = vcmp.eq.s32.totalorder %v1631_v56, %v1742_v42 }
  0x66   : > { %1217 = vmatprep.subr.bf16.mxu0 %v1216_v63  ;;  %v793_v43 = vsel %vm570_vm13, %v1821_v25, %v718_v6  ;;  %v866_v13 = vsel %vm495_vm10, %v1824_v26, %v791_v7  ;;  %vm502_vm3 = vcmp.eq.s32.totalorder %v1634_v57, %v1742_v42  ;;  %vm573_vm4 = vcmp.eq.s32.totalorder %v1631_v56, %v1745_v45 }
  0x67   : > { %v868_v47 = vsel %vm497_vm11, %v1824_v26, %v793_v43  ;;  %v941_v16 = vsel %vm422_vm8, %v1828_v35, %v866_v13  ;;  %vm575_vm5 = vcmp.eq.s32.totalorder %v1634_v57, %v1745_v45  ;;  %vm646_vm6 = vcmp.eq.s32.totalorder %v1631_v56, %v1748_v52 }
  0x68   : > { %v943_v19 = vsel %vm424_vm9, %v1828_v35, %v868_v47  ;;  %vm648_vm7 = vcmp.eq.s32.totalorder %v1634_v57, %v1748_v52  ;;  %v721_v20 = vsel %vm646_vm6, %v1761_v61, 0.0  ;;  %vm426_vm10 = vcmp.eq.s32.totalorder %v1631_v56, %v1731_v40 }
  0x69   : > { %v1218_v54 = vpack.c.bf16 %v943_v19, %v941_v16  ;;  %v723_v24 = vsel %vm648_vm7, %v1761_v61, 0.0  ;;  %v796_v29 = vsel %vm573_vm4, %v1751_v53, %v721_v20  ;;  %vm428_vm8 = vcmp.eq.s32.totalorder %v1634_v57, %v1731_v40 }
  0x6a   : > { %v798_v36 = vsel %vm575_vm5, %v1751_v53, %v723_v24  ;;  %v871_v55 = vsel %vm500_vm1, %v1774_v5, %v796_v29  ;;  %vm499_vm9 = vcmp.eq.s32.totalorder %v1631_v56, %v1783_v9  ;;  %vm501_vm11 = vcmp.eq.s32.totalorder %v1634_v57, %v1783_v9 }
  0x6b   : > { %1219 = vmatpush1.bf16.msra.mxu0 %v1218_v54  ;;  %v873_v38 = vsel %vm502_vm3, %v1774_v5, %v798_v36  ;;  %v946_v46 = vsel %vm427_vm0, %v1728_v39, %v871_v55  ;;  %vm572_vm12 = vcmp.eq.s32.totalorder %v1631_v56, %v1794_v14  ;;  %vm574_vm13 = vcmp.eq.s32.totalorder %v1634_v57, %v1794_v14 }
  0x6c   : > { %v948_v33 = vsel %vm429_vm2, %v1728_v39, %v873_v38  ;;  %vm645_vm14 = vcmp.eq.s32.totalorder %v1631_v56, %v1797_v15  ;;  %vm647_vm15 = vcmp.eq.s32.totalorder %v1634_v57, %v1797_v15  ;;  %vm431_vm0 = vcmp.eq.s32.totalorder %v1637_v58, %v1721_v34 }
  0x6d   : > { %v1220_v37 = vpack.c.bf16 %v948_v33, %v946_v46  ;;  %v720_v50 = vsel %vm645_vm14, %v1758_v60, 0.0  ;;  %v722_v41 = vsel %vm647_vm15, %v1758_v60, 0.0  ;;  %vm433_vm1 = vcmp.eq.s32.totalorder %v1640_v59, %v1721_v34 }
  0x6e   : > { %v795_v51 = vsel %vm572_vm12, %v1821_v25, %v720_v50  ;;  %v797_v48 = vsel %vm574_vm13, %v1821_v25, %v722_v41  ;;  %vm504_vm2 = vcmp.eq.s32.totalorder %v1637_v58, %v1742_v42  ;;  %vm506_vm3 = vcmp.eq.s32.totalorder %v1640_v59, %v1742_v42 }
  0x6f   : > { %1221 = vmatprep.subr.bf16.mxu0 %v1220_v37  ;;  %v870_v44 = vsel %vm499_vm9, %v1824_v26, %v795_v51  ;;  %v872_v62 = vsel %vm501_vm11, %v1824_v26, %v797_v48  ;;  %vm577_vm4 = vcmp.eq.s32.totalorder %v1637_v58, %v1745_v45  ;;  %vm579_vm5 = vcmp.eq.s32.totalorder %v1640_v59, %v1745_v45 }
  0x70   : > { %v945_v63 = vsel %vm426_vm10, %v1828_v35, %v870_v44  ;;  %v947_v49 = vsel %vm428_vm8, %v1828_v35, %v872_v62  ;;  %vm650_vm6 = vcmp.eq.s32.totalorder %v1637_v58, %v1748_v52  ;;  %vm652_vm7 = vcmp.eq.s32.totalorder %v1640_v59, %v1748_v52 }
  0x71   : > { %v1222_v6 = vpack.c.bf16 %v947_v49, %v945_v63  ;;  %v725_v7 = vsel %vm650_vm6, %v1761_v61, 0.0  ;;  %v727_v43 = vsel %vm652_vm7, %v1761_v61, 0.0  ;;  %vm430_vm9 = vcmp.eq.s32.totalorder %v1637_v58, %v1731_v40 }
  0x72   : > { %v800_v56 = vsel %vm577_vm4, %v1751_v53, %v725_v7  ;;  %v802_v13 = vsel %vm579_vm5, %v1751_v53, %v727_v43  ;;  %vm432_vm10 = vcmp.eq.s32.totalorder %v1640_v59, %v1731_v40  ;;  %vm503_vm8 = vcmp.eq.s32.totalorder %v1637_v58, %v1783_v9 }
  0x73   : > { %1223 = vmatpush1.bf16.msra.mxu0 %v1222_v6  ;;  %v875_v57 = vsel %vm504_vm2, %v1774_v5, %v800_v56  ;;  %v877_v47 = vsel %vm506_vm3, %v1774_v5, %v802_v13  ;;  %vm505_vm11 = vcmp.eq.s32.totalorder %v1640_v59, %v1783_v9  ;;  %vm576_vm12 = vcmp.eq.s32.totalorder %v1637_v58, %v1794_v14 }
  0x74   : > { %v950_v16 = vsel %vm431_vm0, %v1728_v39, %v875_v57  ;;  %v952_v19 = vsel %vm433_vm1, %v1728_v39, %v877_v47  ;;  %vm578_vm13 = vcmp.eq.s32.totalorder %v1640_v59, %v1794_v14  ;;  %vm649_vm14 = vcmp.eq.s32.totalorder %v1637_v58, %v1797_v15 }
  0x75   : > { %v1224_v20 = vpack.c.bf16 %v952_v19, %v950_v16  ;;  %vm651_vm15 = vcmp.eq.s32.totalorder %v1640_v59, %v1797_v15  ;;  %v724_v54 = vsel %vm649_vm14, %v1758_v60, 0.0  ;;  %vm435_vm0 = vcmp.eq.s32.totalorder %v1643_v0, %v1721_v34 }
  0x76   : > { %v726_v24 = vsel %vm651_vm15, %v1758_v60, 0.0  ;;  %v799_v29 = vsel %vm576_vm12, %v1821_v25, %v724_v54  ;;  %vm437_vm1 = vcmp.eq.s32.totalorder %v1646_v2, %v1721_v34  ;;  %vm508_vm2 = vcmp.eq.s32.totalorder %v1643_v0, %v1742_v42 }
  0x77   : > { %1225 = vmatprep.subr.bf16.mxu0 %v1224_v20  ;;  %v801_v36 = vsel %vm578_vm13, %v1821_v25, %v726_v24  ;;  %v874_v55 = vsel %vm503_vm8, %v1824_v26, %v799_v29  ;;  %vm510_vm3 = vcmp.eq.s32.totalorder %v1646_v2, %v1742_v42  ;;  %vm581_vm4 = vcmp.eq.s32.totalorder %v1643_v0, %v1745_v45 }
  0x78   : > { %v876_v38 = vsel %vm505_vm11, %v1824_v26, %v801_v36  ;;  %v949_v46 = vsel %vm430_vm9, %v1828_v35, %v874_v55  ;;  %vm583_vm5 = vcmp.eq.s32.totalorder %v1646_v2, %v1745_v45  ;;  %vm654_vm6 = vcmp.eq.s32.totalorder %v1643_v0, %v1748_v52 }
  0x79   : > { %v951_v33 = vsel %vm432_vm10, %v1828_v35, %v876_v38  ;;  %vm656_vm7 = vcmp.eq.s32.totalorder %v1646_v2, %v1748_v52  ;;  %v729_v37 = vsel %vm654_vm6, %v1761_v61, 0.0  ;;  %vm434_vm8 = vcmp.eq.s32.totalorder %v1643_v0, %v1731_v40 }
  0x7a   : > { %v1226_v58 = vpack.c.bf16 %v951_v33, %v949_v46  ;;  %v731_v50 = vsel %vm656_vm7, %v1761_v61, 0.0  ;;  %v804_v41 = vsel %vm581_vm4, %v1751_v53, %v729_v37  ;;  %vm436_vm9 = vcmp.eq.s32.totalorder %v1646_v2, %v1731_v40 }
  0x7b   : > { %v806_v51 = vsel %vm583_vm5, %v1751_v53, %v731_v50  ;;  %v879_v59 = vsel %vm508_vm2, %v1774_v5, %v804_v41  ;;  %vm507_vm10 = vcmp.eq.s32.totalorder %v1643_v0, %v1783_v9  ;;  %vm509_vm11 = vcmp.eq.s32.totalorder %v1646_v2, %v1783_v9 }
  0x7c   : > { %1227 = vmatpush1.bf16.msra.mxu0 %v1226_v58  ;;  %v881_v48 = vsel %vm510_vm3, %v1774_v5, %v806_v51  ;;  %v954_v44 = vsel %vm435_vm0, %v1728_v39, %v879_v59  ;;  %vm580_vm12 = vcmp.eq.s32.totalorder %v1643_v0, %v1794_v14  ;;  %vm582_vm13 = vcmp.eq.s32.totalorder %v1646_v2, %v1794_v14 }
  0x7d   : > { %v956_v62 = vsel %vm437_vm1, %v1728_v39, %v881_v48  ;;  %vm653_vm14 = vcmp.eq.s32.totalorder %v1643_v0, %v1797_v15  ;;  %vm655_vm15 = vcmp.eq.s32.totalorder %v1646_v2, %v1797_v15  ;;  %vm439_vm0 = vcmp.eq.s32.totalorder %v1649_v3, %v1721_v34 }
  0x7e   : > { %v1228_v63 = vpack.c.bf16 %v956_v62, %v954_v44  ;;  %v728_v49 = vsel %vm653_vm14, %v1758_v60, 0.0  ;;  %v730_v6 = vsel %vm655_vm15, %v1758_v60, 0.0  ;;  %vm441_vm2 = vcmp.eq.s32.totalorder %v1652_v4, %v1721_v34 }
  0x7f   : > { %v803_v7 = vsel %vm580_vm12, %v1821_v25, %v728_v49  ;;  %v805_v43 = vsel %vm582_vm13, %v1821_v25, %v730_v6  ;;  %vm512_vm1 = vcmp.eq.s32.totalorder %v1649_v3, %v1742_v42  ;;  %vm514_vm3 = vcmp.eq.s32.totalorder %v1652_v4, %v1742_v42 }
  0x80   : > { %1229 = vmatprep.subr.bf16.mxu0 %v1228_v63  ;;  %v878_v56 = vsel %vm507_vm10, %v1824_v26, %v803_v7  ;;  %v880_v13 = vsel %vm509_vm11, %v1824_v26, %v805_v43  ;;  %vm585_vm4 = vcmp.eq.s32.totalorder %v1649_v3, %v1745_v45  ;;  %vm587_vm5 = vcmp.eq.s32.totalorder %v1652_v4, %v1745_v45 }
  0x81   : > { %v953_v57 = vsel %vm434_vm8, %v1828_v35, %v878_v56  ;;  %v955_v47 = vsel %vm436_vm9, %v1828_v35, %v880_v13  ;;  %vm658_vm6 = vcmp.eq.s32.totalorder %v1649_v3, %v1748_v52  ;;  %vm660_vm7 = vcmp.eq.s32.totalorder %v1652_v4, %v1748_v52 }
  0x82   : > { %v1230_v16 = vpack.c.bf16 %v955_v47, %v953_v57  ;;  %v733_v19 = vsel %vm658_vm6, %v1761_v61, 0.0  ;;  %v735_v20 = vsel %vm660_vm7, %v1761_v61, 0.0  ;;  %vm438_vm10 = vcmp.eq.s32.totalorder %v1649_v3, %v1731_v40 }
  0x83   : > { %v808_v0 = vsel %vm585_vm4, %v1751_v53, %v733_v19  ;;  %v810_v54 = vsel %vm587_vm5, %v1751_v53, %v735_v20  ;;  %vm440_vm8 = vcmp.eq.s32.totalorder %v1652_v4, %v1731_v40  ;;  %vm511_vm9 = vcmp.eq.s32.totalorder %v1649_v3, %v1783_v9 }
  0x84   : > { %1231 = vmatpush1.bf16.msra.mxu0 %v1230_v16  ;;  %v883_v2 = vsel %vm512_vm1, %v1774_v5, %v808_v0  ;;  %v885_v24 = vsel %vm514_vm3, %v1774_v5, %v810_v54  ;;  %vm513_vm11 = vcmp.eq.s32.totalorder %v1652_v4, %v1783_v9  ;;  %vm584_vm12 = vcmp.eq.s32.totalorder %v1649_v3, %v1794_v14 }
  0x85   : > { %v958_v29 = vsel %vm439_vm0, %v1728_v39, %v883_v2  ;;  %v960_v36 = vsel %vm441_vm2, %v1728_v39, %v885_v24  ;;  %vm586_vm13 = vcmp.eq.s32.totalorder %v1652_v4, %v1794_v14  ;;  %vm657_vm14 = vcmp.eq.s32.totalorder %v1649_v3, %v1797_v15 }
  0x86   : > { %v1232_v55 = vpack.c.bf16 %v960_v36, %v958_v29  ;;  %vm659_vm15 = vcmp.eq.s32.totalorder %v1652_v4, %v1797_v15  ;;  %v732_v38 = vsel %vm657_vm14, %v1758_v60, 0.0  ;;  %vm443_vm0 = vcmp.eq.s32.totalorder %v1655_v8, %v1721_v34 }
  0x87   : > { %v734_v46 = vsel %vm659_vm15, %v1758_v60, 0.0  ;;  %v807_v33 = vsel %vm584_vm12, %v1821_v25, %v732_v38  ;;  %vm445_vm2 = vcmp.eq.s32.totalorder %v1658_v10, %v1721_v34  ;;  %vm516_vm1 = vcmp.eq.s32.totalorder %v1655_v8, %v1742_v42 }
  0x88   : > { %1233 = vmatprep.subr.bf16.mxu0 %v1232_v55  ;;  %v809_v37 = vsel %vm586_vm13, %v1821_v25, %v734_v46  ;;  %v882_v58 = vsel %vm511_vm9, %v1824_v26, %v807_v33  ;;  %vm518_vm3 = vcmp.eq.s32.totalorder %v1658_v10, %v1742_v42  ;;  %vm589_vm4 = vcmp.eq.s32.totalorder %v1655_v8, %v1745_v45 }
  0x89   : > { %v884_v50 = vsel %vm513_vm11, %v1824_v26, %v809_v37  ;;  %v957_v41 = vsel %vm438_vm10, %v1828_v35, %v882_v58  ;;  %vm591_vm5 = vcmp.eq.s32.totalorder %v1658_v10, %v1745_v45  ;;  %vm662_vm6 = vcmp.eq.s32.totalorder %v1655_v8, %v1748_v52 }
  0x8a   : > { %v959_v51 = vsel %vm440_vm8, %v1828_v35, %v884_v50  ;;  %vm664_vm7 = vcmp.eq.s32.totalorder %v1658_v10, %v1748_v52  ;;  %v737_v59 = vsel %vm662_vm6, %v1761_v61, 0.0  ;;  %vm442_vm9 = vcmp.eq.s32.totalorder %v1655_v8, %v1731_v40 }
  0x8b   : > { %v1234_v3 = vpack.c.bf16 %v959_v51, %v957_v41  ;;  %v739_v48 = vsel %vm664_vm7, %v1761_v61, 0.0  ;;  %v812_v44 = vsel %vm589_vm4, %v1751_v53, %v737_v59  ;;  %vm444_vm10 = vcmp.eq.s32.totalorder %v1658_v10, %v1731_v40 }
  0x8c   : > { %v814_v62 = vsel %vm591_vm5, %v1751_v53, %v739_v48  ;;  %v887_v4 = vsel %vm516_vm1, %v1774_v5, %v812_v44  ;;  %vm515_vm8 = vcmp.eq.s32.totalorder %v1655_v8, %v1783_v9  ;;  %vm517_vm11 = vcmp.eq.s32.totalorder %v1658_v10, %v1783_v9 }
  0x8d   : > { %1235 = vmatpush1.bf16.msra.mxu0 %v1234_v3  ;;  %v889_v63 = vsel %vm518_vm3, %v1774_v5, %v814_v62  ;;  %v962_v49 = vsel %vm443_vm0, %v1728_v39, %v887_v4  ;;  %vm588_vm12 = vcmp.eq.s32.totalorder %v1655_v8, %v1794_v14  ;;  %vm590_vm13 = vcmp.eq.s32.totalorder %v1658_v10, %v1794_v14 }
  0x8e   : > { %v964_v6 = vsel %vm445_vm2, %v1728_v39, %v889_v63  ;;  %vm661_vm14 = vcmp.eq.s32.totalorder %v1655_v8, %v1797_v15  ;;  %vm663_vm15 = vcmp.eq.s32.totalorder %v1658_v10, %v1797_v15  ;;  %vm447_vm0 = vcmp.eq.s32.totalorder %v1661_v11, %v1721_v34 }
  0x8f   : > { %v1236_v7 = vpack.c.bf16 %v964_v6, %v962_v49  ;;  %v736_v43 = vsel %vm661_vm14, %v1758_v60, 0.0  ;;  %v738_v56 = vsel %vm663_vm15, %v1758_v60, 0.0  ;;  %vm449_vm1 = vcmp.eq.s32.totalorder %v1664_v12, %v1721_v34 }
  0x90   : > { %v811_v13 = vsel %vm588_vm12, %v1821_v25, %v736_v43  ;;  %v813_v57 = vsel %vm590_vm13, %v1821_v25, %v738_v56  ;;  %vm520_vm2 = vcmp.eq.s32.totalorder %v1661_v11, %v1742_v42  ;;  %vm522_vm3 = vcmp.eq.s32.totalorder %v1664_v12, %v1742_v42 }
  0x91   : > { %1237 = vmatprep.subr.bf16.mxu0 %v1236_v7  ;;  %v886_v47 = vsel %vm515_vm8, %v1824_v26, %v811_v13  ;;  %v888_v16 = vsel %vm517_vm11, %v1824_v26, %v813_v57  ;;  %vm593_vm4 = vcmp.eq.s32.totalorder %v1661_v11, %v1745_v45  ;;  %vm595_vm5 = vcmp.eq.s32.totalorder %v1664_v12, %v1745_v45 }
  0x92   : > { %v961_v19 = vsel %vm442_vm9, %v1828_v35, %v886_v47  ;;  %v963_v20 = vsel %vm444_vm10, %v1828_v35, %v888_v16  ;;  %vm666_vm6 = vcmp.eq.s32.totalorder %v1661_v11, %v1748_v52  ;;  %vm668_vm7 = vcmp.eq.s32.totalorder %v1664_v12, %v1748_v52 }
  0x93   : > { %v1238_v0 = vpack.c.bf16 %v963_v20, %v961_v19  ;;  %v741_v54 = vsel %vm666_vm6, %v1761_v61, 0.0  ;;  %v743_v2 = vsel %vm668_vm7, %v1761_v61, 0.0  ;;  %vm446_vm8 = vcmp.eq.s32.totalorder %v1661_v11, %v1731_v40 }
  0x94   : > { %v816_v8 = vsel %vm593_vm4, %v1751_v53, %v741_v54  ;;  %v818_v24 = vsel %vm595_vm5, %v1751_v53, %v743_v2  ;;  %vm448_vm9 = vcmp.eq.s32.totalorder %v1664_v12, %v1731_v40  ;;  %vm519_vm10 = vcmp.eq.s32.totalorder %v1661_v11, %v1783_v9 }
  0x95   : > { %1239 = vmatpush1.bf16.msra.mxu0 %v1238_v0  ;;  %v891_v10 = vsel %vm520_vm2, %v1774_v5, %v816_v8  ;;  %v893_v29 = vsel %vm522_vm3, %v1774_v5, %v818_v24  ;;  %vm521_vm11 = vcmp.eq.s32.totalorder %v1664_v12, %v1783_v9  ;;  %vm592_vm12 = vcmp.eq.s32.totalorder %v1661_v11, %v1794_v14 }
  0x96   : > { %v966_v36 = vsel %vm447_vm0, %v1728_v39, %v891_v10  ;;  %v968_v55 = vsel %vm449_vm1, %v1728_v39, %v893_v29  ;;  %vm594_vm13 = vcmp.eq.s32.totalorder %v1664_v12, %v1794_v14  ;;  %vm665_vm14 = vcmp.eq.s32.totalorder %v1661_v11, %v1797_v15 }
  0x97   : > { %v1240_v38 = vpack.c.bf16 %v968_v55, %v966_v36  ;;  %vm667_vm15 = vcmp.eq.s32.totalorder %v1664_v12, %v1797_v15  ;;  %v740_v46 = vsel %vm665_vm14, %v1758_v60, 0.0  ;;  %vm451_vm0 = vcmp.eq.s32.totalorder %v1675_v17, %v1721_v34 }
  0x98   : > { %v742_v33 = vsel %vm667_vm15, %v1758_v60, 0.0  ;;  %v815_v37 = vsel %vm592_vm12, %v1821_v25, %v740_v46  ;;  %vm453_vm1 = vcmp.eq.s32.totalorder %v1678_v18, %v1721_v34  ;;  %vm524_vm2 = vcmp.eq.s32.totalorder %v1675_v17, %v1742_v42 }
  0x99   : > { %1241 = vmatprep.subr.bf16.mxu0 %v1240_v38  ;;  %v817_v58 = vsel %vm594_vm13, %v1821_v25, %v742_v33  ;;  %v890_v50 = vsel %vm519_vm10, %v1824_v26, %v815_v37  ;;  %vm526_vm3 = vcmp.eq.s32.totalorder %v1678_v18, %v1742_v42  ;;  %vm597_vm4 = vcmp.eq.s32.totalorder %v1675_v17, %v1745_v45 }
  0x9a   : > { %v892_v41 = vsel %vm521_vm11, %v1824_v26, %v817_v58  ;;  %v965_v51 = vsel %vm446_vm8, %v1828_v35, %v890_v50  ;;  %vm599_vm5 = vcmp.eq.s32.totalorder %v1678_v18, %v1745_v45  ;;  %vm670_vm6 = vcmp.eq.s32.totalorder %v1675_v17, %v1748_v52 }
  0x9b   : > { %v967_v59 = vsel %vm448_vm9, %v1828_v35, %v892_v41  ;;  %vm672_vm7 = vcmp.eq.s32.totalorder %v1678_v18, %v1748_v52  ;;  %v745_v3 = vsel %vm670_vm6, %v1761_v61, 0.0  ;;  %vm450_vm10 = vcmp.eq.s32.totalorder %v1675_v17, %v1731_v40 }
  0x9c   : > { %v1242_v11 = vpack.c.bf16 %v967_v59, %v965_v51  ;;  %v747_v48 = vsel %vm672_vm7, %v1761_v61, 0.0  ;;  %v820_v44 = vsel %vm597_vm4, %v1751_v53, %v745_v3  ;;  %vm452_vm8 = vcmp.eq.s32.totalorder %v1678_v18, %v1731_v40 }
  0x9d   : > { %v822_v62 = vsel %vm599_vm5, %v1751_v53, %v747_v48  ;;  %v895_v12 = vsel %vm524_vm2, %v1774_v5, %v820_v44  ;;  %vm523_vm9 = vcmp.eq.s32.totalorder %v1675_v17, %v1783_v9  ;;  %vm525_vm11 = vcmp.eq.s32.totalorder %v1678_v18, %v1783_v9 }
  0x9e   : > { %1243 = vmatpush1.bf16.msra.mxu0 %v1242_v11  ;;  %v897_v4 = vsel %vm526_vm3, %v1774_v5, %v822_v62  ;;  %v970_v63 = vsel %vm451_vm0, %v1728_v39, %v895_v12  ;;  %vm596_vm12 = vcmp.eq.s32.totalorder %v1675_v17, %v1794_v14  ;;  %vm598_vm13 = vcmp.eq.s32.totalorder %v1678_v18, %v1794_v14 }
  0x9f   : > { %v972_v49 = vsel %vm453_vm1, %v1728_v39, %v897_v4  ;;  %vm669_vm14 = vcmp.eq.s32.totalorder %v1675_v17, %v1797_v15  ;;  %vm671_vm15 = vcmp.eq.s32.totalorder %v1678_v18, %v1797_v15  ;;  %vm455_vm0 = vcmp.eq.s32.totalorder %v1685_v21, %v1721_v34 }
  0xa0   : > { %v1244_v6 = vpack.c.bf16 %v972_v49, %v970_v63  ;;  %v744_v7 = vsel %vm669_vm14, %v1758_v60, 0.0  ;;  %v746_v43 = vsel %vm671_vm15, %v1758_v60, 0.0  ;;  %vm457_vm2 = vcmp.eq.s32.totalorder %v1688_v22, %v1721_v34 }
  0xa1   : > { %v819_v56 = vsel %vm596_vm12, %v1821_v25, %v744_v7  ;;  %v821_v13 = vsel %vm598_vm13, %v1821_v25, %v746_v43  ;;  %vm528_vm1 = vcmp.eq.s32.totalorder %v1685_v21, %v1742_v42  ;;  %vm530_vm3 = vcmp.eq.s32.totalorder %v1688_v22, %v1742_v42 }
  0xa2   : > { %1245 = vmatprep.subr.bf16.mxu0 %v1244_v6  ;;  %v894_v57 = vsel %vm523_vm9, %v1824_v26, %v819_v56  ;;  %v896_v47 = vsel %vm525_vm11, %v1824_v26, %v821_v13  ;;  %vm601_vm4 = vcmp.eq.s32.totalorder %v1685_v21, %v1745_v45  ;;  %vm603_vm5 = vcmp.eq.s32.totalorder %v1688_v22, %v1745_v45 }
  0xa3   : > { %v969_v16 = vsel %vm450_vm10, %v1828_v35, %v894_v57  ;;  %v971_v19 = vsel %vm452_vm8, %v1828_v35, %v896_v47  ;;  %vm674_vm6 = vcmp.eq.s32.totalorder %v1685_v21, %v1748_v52  ;;  %vm676_vm7 = vcmp.eq.s32.totalorder %v1688_v22, %v1748_v52 }
  0xa4   : > { %v1246_v20 = vpack.c.bf16 %v971_v19, %v969_v16  ;;  %v749_v0 = vsel %vm674_vm6, %v1761_v61, 0.0  ;;  %v751_v54 = vsel %vm676_vm7, %v1761_v61, 0.0  ;;  %vm454_vm9 = vcmp.eq.s32.totalorder %v1685_v21, %v1731_v40 }
  0xa5   : > { %v824_v17 = vsel %vm601_vm4, %v1751_v53, %v749_v0  ;;  %v826_v2 = vsel %vm603_vm5, %v1751_v53, %v751_v54  ;;  %vm456_vm10 = vcmp.eq.s32.totalorder %v1688_v22, %v1731_v40  ;;  %vm527_vm8 = vcmp.eq.s32.totalorder %v1685_v21, %v1783_v9 }
  0xa6   : > { %1247 = vmatpush1.bf16.msra.mxu0 %v1246_v20  ;;  %v899_v18 = vsel %vm528_vm1, %v1774_v5, %v824_v17  ;;  %v901_v8 = vsel %vm530_vm3, %v1774_v5, %v826_v2  ;;  %vm529_vm11 = vcmp.eq.s32.totalorder %v1688_v22, %v1783_v9  ;;  %vm600_vm12 = vcmp.eq.s32.totalorder %v1685_v21, %v1794_v14 }
  0xa7   : > { %v974_v24 = vsel %vm455_vm0, %v1728_v39, %v899_v18  ;;  %v976_v10 = vsel %vm457_vm2, %v1728_v39, %v901_v8  ;;  %vm602_vm13 = vcmp.eq.s32.totalorder %v1688_v22, %v1794_v14  ;;  %vm673_vm14 = vcmp.eq.s32.totalorder %v1685_v21, %v1797_v15 }
  0xa8   : > { %v1248_v29 = vpack.c.bf16 %v976_v10, %v974_v24  ;;  %vm675_vm15 = vcmp.eq.s32.totalorder %v1688_v22, %v1797_v15  ;;  %v748_v36 = vsel %vm673_vm14, %v1758_v60, 0.0  ;;  %vm459_vm0 = vcmp.eq.s32.totalorder %v1691_v23, %v1721_v34 }
  0xa9   : > { %v750_v55 = vsel %vm675_vm15, %v1758_v60, 0.0  ;;  %v823_v38 = vsel %vm600_vm12, %v1821_v25, %v748_v36  ;;  %vm461_vm2 = vcmp.eq.s32.totalorder %v1698_v27, %v1721_v34  ;;  %vm532_vm1 = vcmp.eq.s32.totalorder %v1691_v23, %v1742_v42 }
  0xaa   : > { %1249 = vmatprep.subr.bf16.mxu0 %v1248_v29  ;;  %v825_v46 = vsel %vm602_vm13, %v1821_v25, %v750_v55  ;;  %v898_v33 = vsel %vm527_vm8, %v1824_v26, %v823_v38  ;;  %vm534_vm3 = vcmp.eq.s32.totalorder %v1698_v27, %v1742_v42  ;;  %vm605_vm4 = vcmp.eq.s32.totalorder %v1691_v23, %v1745_v45 }
  0xab   : > { %v900_v37 = vsel %vm529_vm11, %v1824_v26, %v825_v46  ;;  %v973_v58 = vsel %vm454_vm9, %v1828_v35, %v898_v33  ;;  %vm607_vm5 = vcmp.eq.s32.totalorder %v1698_v27, %v1745_v45  ;;  %vm678_vm6 = vcmp.eq.s32.totalorder %v1691_v23, %v1748_v52 }
  0xac   : > { %v975_v50 = vsel %vm456_vm10, %v1828_v35, %v900_v37  ;;  %vm680_vm7 = vcmp.eq.s32.totalorder %v1698_v27, %v1748_v52  ;;  %v753_v41 = vsel %vm678_vm6, %v1761_v61, 0.0  ;;  %vm458_vm8 = vcmp.eq.s32.totalorder %v1691_v23, %v1731_v40 }
  0xad   : > { %v1250_v21 = vpack.c.bf16 %v975_v50, %v973_v58  ;;  %v755_v51 = vsel %vm680_vm7, %v1761_v61, 0.0  ;;  %v828_v59 = vsel %vm605_vm4, %v1751_v53, %v753_v41  ;;  %vm460_vm9 = vcmp.eq.s32.totalorder %v1698_v27, %v1731_v40 }
  0xae   : > { %v830_v3 = vsel %vm607_vm5, %v1751_v53, %v755_v51  ;;  %v903_v22 = vsel %vm532_vm1, %v1774_v5, %v828_v59  ;;  %vm531_vm10 = vcmp.eq.s32.totalorder %v1691_v23, %v1783_v9  ;;  %vm533_vm11 = vcmp.eq.s32.totalorder %v1698_v27, %v1783_v9 }
  0xaf   : > { %1251 = vmatpush1.bf16.msra.mxu0 %v1250_v21  ;;  %v905_v11 = vsel %vm534_vm3, %v1774_v5, %v830_v3  ;;  %v978_v48 = vsel %vm459_vm0, %v1728_v39, %v903_v22  ;;  %vm604_vm12 = vcmp.eq.s32.totalorder %v1691_v23, %v1794_v14  ;;  %vm606_vm13 = vcmp.eq.s32.totalorder %v1698_v27, %v1794_v14 }
  0xb0   : > { %v980_v44 = vsel %vm461_vm2, %v1728_v39, %v905_v11  ;;  %vm677_vm14 = vcmp.eq.s32.totalorder %v1691_v23, %v1797_v15  ;;  %vm679_vm15 = vcmp.eq.s32.totalorder %v1698_v27, %v1797_v15  ;;  %vm463_vm0 = vcmp.eq.s32.totalorder %v1701_v28, %v1721_v34 }
  0xb1   : > { %v1252_v62 = vpack.c.bf16 %v980_v44, %v978_v48  ;;  %v752_v12 = vsel %vm677_vm14, %v1758_v60, 0.0  ;;  %v754_v4 = vsel %vm679_vm15, %v1758_v60, 0.0  ;;  %vm465_vm1 = vcmp.eq.s32.totalorder %v1708_v30, %v1721_v34 }
  0xb2   : > { %v827_v63 = vsel %vm604_vm12, %v1821_v25, %v752_v12  ;;  %v829_v49 = vsel %vm606_vm13, %v1821_v25, %v754_v4  ;;  %vm536_vm2 = vcmp.eq.s32.totalorder %v1701_v28, %v1742_v42  ;;  %vm538_vm3 = vcmp.eq.s32.totalorder %v1708_v30, %v1742_v42 }
  0xb3   : > { %1253 = vmatprep.subr.bf16.mxu0 %v1252_v62  ;;  %v902_v6 = vsel %vm531_vm10, %v1824_v26, %v827_v63  ;;  %v904_v7 = vsel %vm533_vm11, %v1824_v26, %v829_v49  ;;  %vm609_vm4 = vcmp.eq.s32.totalorder %v1701_v28, %v1745_v45  ;;  %vm611_vm5 = vcmp.eq.s32.totalorder %v1708_v30, %v1745_v45 }
  0xb4   : > { %v977_v43 = vsel %vm458_vm8, %v1828_v35, %v902_v6  ;;  %v979_v56 = vsel %vm460_vm9, %v1828_v35, %v904_v7  ;;  %vm682_vm6 = vcmp.eq.s32.totalorder %v1701_v28, %v1748_v52  ;;  %vm684_vm7 = vcmp.eq.s32.totalorder %v1708_v30, %v1748_v52 }
  0xb5   : > { %v1254_v13 = vpack.c.bf16 %v979_v56, %v977_v43  ;;  %v757_v57 = vsel %vm682_vm6, %v1761_v61, 0.0  ;;  %v759_v47 = vsel %vm684_vm7, %v1761_v61, 0.0  ;;  %vm462_vm10 = vcmp.eq.s32.totalorder %v1701_v28, %v1731_v40 }
  0xb6   : > { %v832_v23 = vsel %vm609_vm4, %v1751_v53, %v757_v57  ;;  %v834_v16 = vsel %vm611_vm5, %v1751_v53, %v759_v47  ;;  %vm464_vm8 = vcmp.eq.s32.totalorder %v1708_v30, %v1731_v40  ;;  %vm535_vm9 = vcmp.eq.s32.totalorder %v1701_v28, %v1783_v9 }
  0xb7   : > { %1255 = vmatpush1.bf16.msra.mxu0 %v1254_v13  ;;  %v907_v27 = vsel %vm536_vm2, %v1774_v5, %v832_v23  ;;  %v909_v19 = vsel %vm538_vm3, %v1774_v5, %v834_v16  ;;  %vm537_vm11 = vcmp.eq.s32.totalorder %v1708_v30, %v1783_v9  ;;  %vm608_vm12 = vcmp.eq.s32.totalorder %v1701_v28, %v1794_v14 }
  0xb8   : > { %v982_v20 = vsel %vm463_vm0, %v1728_v39, %v907_v27  ;;  %v984_v0 = vsel %vm465_vm1, %v1728_v39, %v909_v19  ;;  %vm610_vm13 = vcmp.eq.s32.totalorder %v1708_v30, %v1794_v14  ;;  %vm681_vm14 = vcmp.eq.s32.totalorder %v1701_v28, %v1797_v15 }
  0xb9   : > { %v1256_v54 = vpack.c.bf16 %v984_v0, %v982_v20  ;;  %vm683_vm15 = vcmp.eq.s32.totalorder %v1708_v30, %v1797_v15  ;;  %v756_v17 = vsel %vm681_vm14, %v1758_v60, 0.0  ;;  %vm467_vm0 = vcmp.eq.s32.totalorder %v1711_v31, %v1721_v34 }
  0xba   : > { %v758_v2 = vsel %vm683_vm15, %v1758_v60, 0.0  ;;  %v831_v18 = vsel %vm608_vm12, %v1821_v25, %v756_v17  ;;  %vm469_vm1 = vcmp.eq.s32.totalorder %v1714_v32, %v1721_v34  ;;  %vm540_vm2 = vcmp.eq.s32.totalorder %v1711_v31, %v1742_v42 }
  0xbb   : > { %1257 = vmatprep.subr.bf16.mxu0 %v1256_v54  ;;  %v833_v8 = vsel %vm610_vm13, %v1821_v25, %v758_v2  ;;  %v906_v24 = vsel %vm535_vm9, %v1824_v26, %v831_v18  ;;  %vm542_vm3 = vcmp.eq.s32.totalorder %v1714_v32, %v1742_v42  ;;  %vm613_vm4 = vcmp.eq.s32.totalorder %v1711_v31, %v1745_v45 }
  0xbc   : > { %v908_v10 = vsel %vm537_vm11, %v1824_v26, %v833_v8  ;;  %v981_v29 = vsel %vm462_vm10, %v1828_v35, %v906_v24  ;;  %vm615_vm5 = vcmp.eq.s32.totalorder %v1714_v32, %v1745_v45  ;;  %vm686_vm6 = vcmp.eq.s32.totalorder %v1711_v31, %v1748_v52 }
  0xbd   : > { %v983_v36 = vsel %vm464_vm8, %v1828_v35, %v908_v10  ;;  %vm688_vm7 = vcmp.eq.s32.totalorder %v1714_v32, %v1748_v52  ;;  %v761_v55 = vsel %vm686_vm6, %v1761_v61, 0.0  ;;  %vm466_vm9 = vcmp.eq.s32.totalorder %v1711_v31, %v1731_v40 }
  0xbe   : > { %v1258_v28 = vpack.c.bf16 %v983_v36, %v981_v29  ;;  %v763_v38 = vsel %vm688_vm7, %v1761_v61, 0.0  ;;  %v836_v46 = vsel %vm613_vm4, %v1751_v53, %v761_v55  ;;  %vm468_vm10 = vcmp.eq.s32.totalorder %v1714_v32, %v1731_v40 }
  0xbf   : > { %v838_v33 = vsel %vm615_vm5, %v1751_v53, %v763_v38  ;;  %v911_v30 = vsel %vm540_vm2, %v1774_v5, %v836_v46  ;;  %vm539_vm8 = vcmp.eq.s32.totalorder %v1711_v31, %v1783_v9  ;;  %vm541_vm11 = vcmp.eq.s32.totalorder %v1714_v32, %v1783_v9 }
  0xc0   : > { %1259 = vmatpush1.bf16.msra.mxu0 %v1258_v28  ;;  %v913_v37 = vsel %vm542_vm3, %v1774_v5, %v838_v33  ;;  %v986_v58 = vsel %vm467_vm0, %v1728_v39, %v911_v30  ;;  %vm612_vm12 = vcmp.eq.s32.totalorder %v1711_v31, %v1794_v14  ;;  %vm614_vm13 = vcmp.eq.s32.totalorder %v1714_v32, %v1794_v14 }
  0xc1   : > { %v988_v50 = vsel %vm469_vm1, %v1728_v39, %v913_v37  ;;  %vm685_vm14 = vcmp.eq.s32.totalorder %v1711_v31, %v1797_v15  ;;  %vm687_vm15 = vcmp.eq.s32.totalorder %v1714_v32, %v1797_v15  ;;  %v248_v41 = vadd.s32 240, %v1590_v1 }
  0xc2   : > { %v1260_v21 = vpack.c.bf16 %v988_v50, %v986_v58  ;;  %v760_v51 = vsel %vm685_vm14, %v1758_v60, 0.0  ;;  %v762_v59 = vsel %vm687_vm15, %v1758_v60, 0.0  ;;  %v249_v3 = vadd.s32 248, %v1590_v1 }
  0xc3   : > { %v835_v22 = vsel %vm612_vm12, %v1821_v25, %v760_v51  ;;  %v837_v11 = vsel %vm614_vm13, %v1821_v25, %v762_v59  ;;  %vm471_vm0 = vcmp.eq.s32.totalorder %v248_v41, %v1721_v34  ;;  %vm544_vm1 = vcmp.eq.s32.totalorder %v248_v41, %v1742_v42 }
  0xc4   : > { %1261 = vmatprep.subr.bf16.mxu0 %v1260_v21  ;;  %v910_v48 = vsel %vm539_vm8, %v1824_v26, %v835_v22  ;;  %v912_v1 = vsel %vm541_vm11, %v1824_v26, %v837_v11  ;;  %vm473_vm2 = vcmp.eq.s32.totalorder %v249_v3, %v1721_v34  ;;  %vm546_vm3 = vcmp.eq.s32.totalorder %v249_v3, %v1742_v42 }
  0xc5   : > { %v985_v44 = vsel %vm466_vm9, %v1828_v35, %v910_v48  ;;  %v987_v62 = vsel %vm468_vm10, %v1828_v35, %v912_v1  ;;  %vm617_vm4 = vcmp.eq.s32.totalorder %v248_v41, %v1745_v45  ;;  %vm619_vm5 = vcmp.eq.s32.totalorder %v249_v3, %v1745_v45 }
  0xc6   : > { %v1262_v12 = vpack.c.bf16 %v987_v62, %v985_v44  ;;  %vm690_vm6 = vcmp.eq.s32.totalorder %v248_v41, %v1748_v52  ;;  %vm692_vm7 = vcmp.eq.s32.totalorder %v249_v3, %v1748_v52  ;;  %vm470_vm9 = vcmp.eq.s32.totalorder %v248_v41, %v1731_v40  ;;  %v216_v52 = vld [vmem:[%s206_s29] sm:$0xff] }
  0xc7   : > { %v765_v31 = vsel %vm690_vm6, %v1761_v61, 0.0  ;;  %v767_v32 = vsel %vm692_vm7, %v1761_v61, 0.0  ;;  %vm472_vm10 = vcmp.eq.s32.totalorder %v249_v3, %v1731_v40  ;;  %vm543_vm8 = vcmp.eq.s32.totalorder %v248_v41, %v1783_v9 }
  0xc8   : > { %1263 = vmatpush1.bf16.msra.mxu0 %v1262_v12  ;;  %v840_v45 = vsel %vm617_vm4, %v1751_v53, %v765_v31  ;;  %v842_v4 = vsel %vm619_vm5, %v1751_v53, %v767_v32  ;;  %vm545_vm11 = vcmp.eq.s32.totalorder %v249_v3, %v1783_v9  ;;  %vm616_vm12 = vcmp.eq.s32.totalorder %v248_v41, %v1794_v14 }
  0xc9   : > { %v915_v63 = vsel %vm544_vm1, %v1774_v5, %v840_v45  ;;  %v917_v61 = vsel %vm546_vm3, %v1774_v5, %v842_v4  ;;  %vm618_vm13 = vcmp.eq.s32.totalorder %v249_v3, %v1794_v14  ;;  %vm689_vm14 = vcmp.eq.s32.totalorder %v248_v41, %v1797_v15 }
  0xca   : > { %v990_v53 = vsel %vm471_vm0, %v1728_v39, %v915_v63  ;;  %v992_v49 = vsel %vm473_vm2, %v1728_v39, %v917_v61  ;;  %vm691_vm15 = vcmp.eq.s32.totalorder %v249_v3, %v1797_v15  ;;  %v764_v6 = vsel %vm689_vm14, %v1758_v60, 0.0 }
  0xcb   : > { %v1264_v42 = vpack.c.bf16 %v992_v49, %v990_v53  ;;  %v766_v5 = vsel %vm691_vm15, %v1758_v60, 0.0  ;;  %v839_v14 = vsel %vm616_vm12, %v1821_v25, %v764_v6  ;;  %v994_v7 = vcombine.high %v216_v52, %v216_v52 }
  0xcc   : > { %v841_v43 = vsel %vm618_vm13, %v1821_v25, %v766_v5  ;;  %v914_v34 = vsel %vm543_vm8, %v1824_v26, %v839_v14 }
  0xcd   : > { %1265 = vmatprep.subr.bf16.mxu0 %v1264_v42  ;;  %v916_v39 = vsel %vm545_vm11, %v1824_v26, %v841_v43  ;;  %v989_v15 = vsel %vm470_vm9, %v1828_v35, %v914_v34  ;;  %1060 = vmatprep.mubr.f32.mxu0 %v994_v7 }
  0xce   : > { %v991_v60 = vsel %vm472_vm10, %v1828_v35, %v916_v39 }
  0xcf   : > { %v1266_v56 = vpack.c.bf16 %v991_v60, %v989_v15 }
  0xd1   : > { %1267 = vmatpush1.bf16.msra.mxu0 %v1266_v56 }
  0xd4   : > { %1061 = vmatmul.mubr.f32.vlgmr.msra.gmra.mrb[0].mxu0 %v216_v52 }
 0x1a7   : > { %v1062_v9 = vpop.f32.mrb[0].mxu0 }
 0x1a8   : > { %v1064_v25 = vpop.f32.mrb[1].mxu0 }
 0x1a9   : > { %v1069_v26 = vcombine.low %v1062_v9, %v1064_v25 }
 0x1ab   : > { %1071 = vst [vmem:[%s201_s22] sm:$0xff] %v1069_v26 }
 0x1ac   : > { %1376 = shalt.err (!%p1373_p8)
}
 0x1ad   : > { %s1377_s0 = scalar_lea.hbm %s2917_s1, 128  ;;  %s1381_s7 = scalar_lea.hbm %s2979_s3, 2304 }
 0x1ae   : > { %p1378_p9 = scmp.ne.s32.totalorder %s2917_s1, %s1377_s0  ;;  %p1382_p12 = scmp.lt.u32.totalorder %s2917_s1, %s2979_s3 }
 0x1af   : > { %p1383_p13 = scmp.lt.u32.totalorder %s1381_s7, %s1377_s0  ;;  %p1385_p1 = scmp.lt.u32.totalorder %s1377_s0, %s2917_s1 }
 0x1b0   : > { %p1379_p10 = pnand %p1378_p9, %p1559_p5 }
 0x1b1   : > { %p1384_p0 = por %p1383_p13, %p1382_p12 }
 0x1b2   : > { %p1380_p11 = pneg %p1379_p10 }
 0x1b3   : > { %p1386_p2 = por %p1385_p1, %p1384_p0 }
 0x1b5   : > { %p1387_p3 = pnand %p1386_p2, %p1380_p11 }
 0x1b7   : > { %1390 = shalt.err (!%p1387_p3)
}
 0x1b8   : > { %1274 = dma.vmem_to_hbm [thread:$0]  (%p1559_p5), %s2919_s25, 128, %s2917_s1, %s1073_s15  }
 0x1b9 PF: > { %p1280_p4 = scmp.ge.s32.totalorder %s1473_s21, 2  ;;  %s1103_s11 = sand.u32 1, %s1437_s12  }
 0x1ba   : > { %s1104_s22 = scalar_lea.sflag [#allocation3], %s1103_s11 }
 0x1bb   : > { %p1277_p6 = pnand %p1280_p4, %p1566_p7 }
 0x1bd   : > { %1432 = dma.done.wait (!%p1277_p6), %s1104_s22, 128  }
 0x1be   : > { %1434 = vsyncadd (!%p1277_p6), %s1104_s22, 4294967168  ;;  %s16_s21 = sadd.s32 1, %s1473_s21   ;;  %s2994_s12 = smov %s1441_s13 }
 0x1bf   : > { %p13_p8 = scmp.ge.s32.totalorder %s16_s21, 20   ;;  %s2995_s13 = smov %s1445_s14 }
 0x1c0   : > { %s2996_s14 = smov %s1582_s8  ;;  %s2997_s15 = smov %s1461_s18 }
 0x1c1   : > { %s2998_s16 = smov %s1465_s19  ;;  %s2999_s17 = smov %s1469_s20 }
 0x1c2   : > { %s3000_s18 = smov %s3004_s23  ;;  %s3001_s19 = smov %s3008_s24 }
 0x1c3   : > { %s3002_s20 = smov %s3012_s26  ;;  %15 = sbr.rel (!%p13_p8) target bundleno = 9 (0x9), region = 71 }
 0x1ca   :  { %1109 = vsyncpa [#allocation3], 1 }
 0x1cb   :  { %1111 = vsyncpa [#allocation3 + $0x1], 1 }

</bundles_post_ra>
